<compile_context>
chip_gen: v7x
topology: tpu7x:2x2x1
jax: 0.10.0
libtpu: 0.0.40
codegen_flags: <defaults>
</compile_context>

<pallas_src>
import jax
import jax.numpy as jnp
from jax.experimental import pallas as pl
from jax.experimental.pallas import tpu as pltpu

# ---- scaled-down BERT config ----
B, S = 2, 8            # batch, sequence length
H, NH, L = 128, 2, 2   # hidden size, attention heads, encoder layers
DH = H // NH           # head dim
I = 512                # intermediate (FFN) size
VOCAB, TYPES, MAXPOS = 64, 2, 16
LN_EPS = 1e-12
DROPOUT_P = 0.3        # nn.Dropout(0.3): identity in inference/eval mode
OUT_PAD = 128          # lane-dense padding for the (B, 1) logit output
BS = B * S             # rows folded into the matmul M dimension


# ------------------------------ Pallas kernel ------------------------------
def _layernorm(x, g, b):
    """LayerNorm over the last axis (f32 math, EUP rsqrt)."""
    mu = jnp.mean(x, axis=-1, keepdims=True)
    xc = x - mu
    var = jnp.mean(xc * xc, axis=-1, keepdims=True)
    return xc * jax.lax.rsqrt(var + LN_EPS) * g + b


def _encoder_kernel(bias_ref, x0_ref, eg_ref, eb_ref,
                    wqkv_ref, bqkv_ref, wo_ref, bo_ref, g1_ref, b1_ref,
                    wi_ref, bi_ref, wf_ref, bf_ref, g2_ref, b2_ref,
                    pw_ref, pb_ref, ow_ref, ob_ref,
                    logit_ref, acc_ref):
    """One grid step = one encoder layer over the whole (B*S, H) activation.

    grid = (L,); the activation for all batch rows stays resident in
    `acc_ref` (VMEM) across the layer axis.  Per-layer weights stream in once
    per layer (index_map depends only on `l`).
    """
    l = pl.program_id(0)

    # l == 0: residual-free embedding LayerNorm initializes the resident tile.
    @pl.when(l == 0)
    def _():
        acc_ref[...] = _layernorm(x0_ref[...], eg_ref[...], eb_ref[...])

    x = acc_ref[...]                                   # (B*S, H) f32
    xb = x.astype(jnp.bfloat16)

    # ---- fused QKV projection: one (B*S, H) @ (H, 3H) MXU call ----
    qkv = jnp.dot(xb, wqkv_ref[...],
                  preferred_element_type=jnp.float32) + bqkv_ref[...]

    bias = bias_ref[...]                               # (B, 1, S) additive mask
    scale = 1.0 / (DH ** 0.5)

    # ---- attention: batched per-head scores on a (B, S, ·) view ----
    # TODO(synk): at real NH=12 use lax.fori_loop (or 2-head / 128-lane pairs)
    # instead of Python unrolling to bound live ranges and keep lane slices
    # 128-aligned.
    ctx_heads = []
    for h in range(NH):
        qh = qkv[:, h * DH:(h + 1) * DH].reshape(B, S, DH).astype(jnp.bfloat16)
        kh = qkv[:, H + h * DH:H + (h + 1) * DH].reshape(B, S, DH) \
            .astype(jnp.bfloat16)
        vh = qkv[:, 2 * H + h * DH:2 * H + (h + 1) * DH].reshape(B, S, DH) \
            .astype(jnp.bfloat16)

        s = jnp.einsum('bqd,bkd->bqk', qh, kh,
                       preferred_element_type=jnp.float32)          # (B, S, S)
        s = s * scale + bias
        m = jnp.max(s, axis=-1, keepdims=True)
        p = jnp.exp(s - m)
        p = p / jnp.sum(p, axis=-1, keepdims=True)                  # exact div

        ctx = jnp.einsum('bqk,bkd->bqd', p.astype(jnp.bfloat16), vh,
                         preferred_element_type=jnp.float32)        # (B, S, DH)
        ctx_heads.append(ctx.reshape(BS, DH))

    # concatenate head contexts lane-wise -> ONE K=H output projection
    ctx_all = jnp.concatenate(ctx_heads, axis=-1).astype(jnp.bfloat16)  # (BS,H)
    attn = jnp.dot(ctx_all, wo_ref[...],
                   preferred_element_type=jnp.float32) + bo_ref[...]

    # ---- Add & LN1 (fused epilogue, result never leaves VMEM) ----
    x1 = _layernorm(attn + x, g1_ref[...], b1_ref[...])

    # ---- FFN: dense -> GELU -> dense, fused Add & LN2 ----
    inter = jnp.dot(x1.astype(jnp.bfloat16), wi_ref[...],
                    preferred_element_type=jnp.float32) + bi_ref[...]
    # TODO(synk): HF BERT uses exact erf-GELU; tanh approximation used here.
    inter = jax.nn.gelu(inter, approximate=True)
    ffn = jnp.dot(inter.astype(jnp.bfloat16), wf_ref[...],
                  preferred_element_type=jnp.float32) + bf_ref[...]
    x2 = _layernorm(ffn + x1, g2_ref[...], b2_ref[...])
    acc_ref[...] = x2

    # ---- last layer: fused pooler + Dropout(identity, eval) + Linear(H,1) ----
    @pl.when(l == L - 1)
    def _():
        # CLS rows are rows b*S of the folded activation (static B at toy size)
        cls = jnp.concatenate([x2[b * S:b * S + 1, :] for b in range(B)],
                              axis=0).astype(jnp.bfloat16)          # (B, H)
        pooled = jnp.tanh(
            jnp.dot(cls, pw_ref[...], preferred_element_type=jnp.float32)
            + pb_ref[...])                                          # (B, H)
        logit = jnp.sum(pooled * ow_ref[...], axis=-1, keepdims=True) \
            + ob_ref[...]                                           # (B, 1)
        # lane-dense padded store; wrapper slices column 0
        logit_ref[...] = jnp.broadcast_to(logit, (B, OUT_PAD))


def _fused_forward(bias, x0, p):
    const2 = lambda l: (0, 0)
    const3 = lambda l: (0, 0, 0)
    per_l3 = lambda l: (l, 0, 0)

    in_specs = [
        pl.BlockSpec((B, 1, S), const3),             # attention bias (B,1,S)
        pl.BlockSpec((BS, H), const2),               # embeddings pre-LN (B*S,H)
        pl.BlockSpec((1, H), const2),                # emb LN gamma
        pl.BlockSpec((1, H), const2),                # emb LN beta
        pl.BlockSpec((None, H, 3 * H), per_l3),      # wqkv (L,H,3H) bf16
        pl.BlockSpec((None, 1, 3 * H), per_l3),      # bqkv
        pl.BlockSpec((None, H, H), per_l3),          # wo   (L,H,H) bf16
        pl.BlockSpec((None, 1, H), per_l3),          # bo
        pl.BlockSpec((None, 1, H), per_l3),          # ln1 gamma
        pl.BlockSpec((None, 1, H), per_l3),          # ln1 beta
        pl.BlockSpec((None, H, I), per_l3),          # wi   (L,H,I) bf16
        pl.BlockSpec((None, 1, I), per_l3),          # bi
        pl.BlockSpec((None, I, H), per_l3),          # wf   (L,I,H) bf16
        pl.BlockSpec((None, 1, H), per_l3),          # bf
        pl.BlockSpec((None, 1, H), per_l3),          # ln2 gamma
        pl.BlockSpec((None, 1, H), per_l3),          # ln2 beta
        pl.BlockSpec((H, H), const2),                # pooler W (bf16)
        pl.BlockSpec((1, H), const2),                # pooler b
        pl.BlockSpec((1, H), const2),                # out W (row layout)
        pl.BlockSpec((1, 1), const2),                # out b
    ]
    out_spec = pl.BlockSpec((B, OUT_PAD), const2)

    return pl.pallas_call(
        _encoder_kernel,
        out_shape=jax.ShapeDtypeStruct((B, OUT_PAD), jnp.float32),
        grid_spec=pltpu.PrefetchScalarGridSpec(
            num_scalar_prefetch=0,
            grid=(L,),                               # layer axis only, weights
            in_specs=in_specs,                       # fetched once per layer
            out_specs=out_spec,
            scratch_shapes=[pltpu.VMEM((BS, H), jnp.float32)],
        ),
        # L carries the activation -> must stay sequential ("arbitrary").
        # At real scale add an M-tile "parallel" axis for megacore and consider
        # pl.Buffered(3) on the wi/wf streams if DMA is still exposed.
        compiler_params=pltpu.CompilerParams(
            dimension_semantics=("arbitrary",),
            vmem_limit_bytes=48 * 1024 * 1024),
    )(bias, x0, p["emb_ln_g"], p["emb_ln_b"],
      p["wqkv"], p["bqkv"], p["wo"], p["bo"], p["ln1_g"], p["ln1_b"],
      p["wi"], p["bi"], p["wf"], p["bf"], p["ln2_g"], p["ln2_b"],
      p["pool_w"], p["pool_b"], p["out_w"], p["out_b"])


# ------------------------------ model (glue) ------------------------------
def bert_base_uncased(params, ids, mask, token_type_ids):
    """Forward semantics of the PyTorch BERTBaseUncased module (eval mode)."""
    # extended attention mask: (1 - mask) * -10000, added to attention scores
    ext = (1.0 - mask.astype(jnp.float32)) * -10000.0      # (B, S)
    bias = ext[:, None, :]                                 # (B, 1, S)

    # TODO(synk): embedding-table gathers stay in XLA (jnp.take); no clean
    # benefit to a Pallas gather at this size.
    we = jnp.take(params["word_emb"], ids, axis=0)             # (B,S,H)
    pe = params["pos_emb"][:S][None, :, :]                     # (1,S,H)
    te = jnp.take(params["type_emb"], token_type_ids, axis=0)  # (B,S,H)
    x0 = (we + pe + te).reshape(BS, H)                         # batch folded in M

    padded = _fused_forward(bias, x0, params)                  # (B, OUT_PAD)
    return padded[:, :1]                                       # (B, 1)


# ------------------------------ parameter init ------------------------------
def init_params(key):
    counter = [0]

    def nk():
        counter[0] += 1
        return jax.random.fold_in(key, counter[0])

    def normal(shape, scale=0.02, dtype=jnp.float32):
        return (scale * jax.random.normal(nk(), shape, jnp.float32)).astype(dtype)

    return dict(
        # embeddings (f32)
        word_emb=normal((VOCAB, H)),
        pos_emb=normal((MAXPOS, H)),
        type_emb=normal((TYPES, H)),
        emb_ln_g=jnp.ones((1, H), jnp.float32),
        emb_ln_b=jnp.zeros((1, H), jnp.float32),
        # encoder layers: weights stacked on a leading L axis, MXU operands bf16
        wqkv=normal((L, H, 3 * H), dtype=jnp.bfloat16),
        bqkv=jnp.zeros((L, 1, 3 * H), jnp.float32),
        wo=normal((L, H, H), dtype=jnp.bfloat16),
        bo=jnp.zeros((L, 1, H), jnp.float32),
        ln1_g=jnp.ones((L, 1, H), jnp.float32),
        ln1_b=jnp.zeros((L, 1, H), jnp.float32),
        wi=normal((L, H, I), dtype=jnp.bfloat16),
        bi=jnp.zeros((L, 1, I), jnp.float32),
        wf=normal((L, I, H), dtype=jnp.bfloat16),
        bf=jnp.zeros((L, 1, H), jnp.float32),
        ln2_g=jnp.ones((L, 1, H), jnp.float32),
        ln2_b=jnp.zeros((L, 1, H), jnp.float32),
        # pooler + classifier head
        pool_w=normal((H, H), dtype=jnp.bfloat16),
        pool_b=jnp.zeros((1, H), jnp.float32),
        out_w=normal((1, H)),     # row layout of nn.Linear(H, 1).weight
        out_b=jnp.zeros((1, 1), jnp.float32),
    )


if __name__ == "__main__":
    root = jax.random.PRNGKey(0)
    pkey, ikey = jax.random.split(root)
    params = init_params(pkey)

    ids = jax.random.randint(jax.random.fold_in(ikey, 0), (B, S), 0, VOCAB,
                             dtype=jnp.int32)
    mask = jnp.ones((B, S), dtype=jnp.int32)
    token_type_ids = jnp.zeros((B, S), dtype=jnp.int32)

    out = jax.jit(bert_base_uncased)(params, ids, mask, token_type_ids)
    out = jax.block_until_ready(out)
    assert out.shape == (B, 1) and out.dtype == jnp.float32
    print("KERNEL_OK")
</pallas_src>

<mosaic_0001>
module attributes {stable_mosaic.version = 11 : i64} {
  func.func @_encoder_kernel(%arg0: i32, %arg1: memref<2x1x8xf32, #tpu.memory_space<vmem>>, %arg2: memref<16x128xf32, #tpu.memory_space<vmem>>, %arg3: memref<1x128xf32, #tpu.memory_space<vmem>>, %arg4: memref<1x128xf32, #tpu.memory_space<vmem>>, %arg5: memref<1x128x384xbf16, #tpu.memory_space<vmem>>, %arg6: memref<1x1x384xf32, #tpu.memory_space<vmem>>, %arg7: memref<1x128x128xbf16, #tpu.memory_space<vmem>>, %arg8: memref<1x1x128xf32, #tpu.memory_space<vmem>>, %arg9: memref<1x1x128xf32, #tpu.memory_space<vmem>>, %arg10: memref<1x1x128xf32, #tpu.memory_space<vmem>>, %arg11: memref<1x128x512xbf16, #tpu.memory_space<vmem>>, %arg12: memref<1x1x512xf32, #tpu.memory_space<vmem>>, %arg13: memref<1x512x128xbf16, #tpu.memory_space<vmem>>, %arg14: memref<1x1x128xf32, #tpu.memory_space<vmem>>, %arg15: memref<1x1x128xf32, #tpu.memory_space<vmem>>, %arg16: memref<1x1x128xf32, #tpu.memory_space<vmem>>, %arg17: memref<128x128xbf16, #tpu.memory_space<vmem>>, %arg18: memref<1x128xf32, #tpu.memory_space<vmem>>, %arg19: memref<1x128xf32, #tpu.memory_space<vmem>>, %arg20: memref<1x1xf32, #tpu.memory_space<vmem>>, %arg21: memref<2x128xf32, #tpu.memory_space<vmem>>, %arg22: memref<16x128xf32, #tpu.memory_space<vmem>>) attributes {dimension_semantics = [#tpu.dimension_semantics<arbitrary>], iteration_bounds = array<i64: 2>, scalar_prefetch = 0 : i64, scratch_operands = 1 : i64, tpu.core_type = #tpu.core_type<tc>, window_params = [{pipeline_mode = #tpu.pipeline_mode<synchronous>, transform_indices = @transform_0, window_bounds = array<i64: 2, 1, 8>}, {pipeline_mode = #tpu.pipeline_mode<synchronous>, transform_indices = @transform_1, window_bounds = array<i64: 16, 128>}, {pipeline_mode = #tpu.pipeline_mode<synchronous>, transform_indices = @transform_2, window_bounds = array<i64: 1, 128>}, {pipeline_mode = #tpu.pipeline_mode<synchronous>, transform_indices = @transform_3, window_bounds = array<i64: 1, 128>}, {transform_indices = @transform_4, window_bounds = array<i64: 1, 128, 384>}, {transform_indices = @transform_5, window_bounds = array<i64: 1, 1, 384>}, {transform_indices = @transform_6, window_bounds = array<i64: 1, 128, 128>}, {transform_indices = @transform_7, window_bounds = array<i64: 1, 1, 128>}, {transform_indices = @transform_8, window_bounds = array<i64: 1, 1, 128>}, {transform_indices = @transform_9, window_bounds = array<i64: 1, 1, 128>}, {transform_indices = @transform_10, window_bounds = array<i64: 1, 128, 512>}, {transform_indices = @transform_11, window_bounds = array<i64: 1, 1, 512>}, {transform_indices = @transform_12, window_bounds = array<i64: 1, 512, 128>}, {transform_indices = @transform_13, window_bounds = array<i64: 1, 1, 128>}, {transform_indices = @transform_14, window_bounds = array<i64: 1, 1, 128>}, {transform_indices = @transform_15, window_bounds = array<i64: 1, 1, 128>}, {pipeline_mode = #tpu.pipeline_mode<synchronous>, transform_indices = @transform_16, window_bounds = array<i64: 128, 128>}, {pipeline_mode = #tpu.pipeline_mode<synchronous>, transform_indices = @transform_17, window_bounds = array<i64: 1, 128>}, {pipeline_mode = #tpu.pipeline_mode<synchronous>, transform_indices = @transform_18, window_bounds = array<i64: 1, 128>}, {pipeline_mode = #tpu.pipeline_mode<synchronous>, transform_indices = @transform_19, window_bounds = array<i64: 1, 1>}, {pipeline_mode = #tpu.pipeline_mode<synchronous>, transform_indices = @transform_20, window_bounds = array<i64: 2, 128>}]} {
    %c0_i32 = arith.constant 0 : i32
    %0 = arith.cmpi eq, %arg0, %c0_i32 : i32
    %1 = arith.extui %0 : i1 to i32
    %c0_i32_0 = arith.constant 0 : i32
    %2 = arith.cmpi ne, %1, %c0_i32_0 : i32
    scf.if %2 {
      %c0_71 = arith.constant 0 : index
      %c0_72 = arith.constant 0 : index
      %157 = vector.load %arg2[%c0_71, %c0_72] : memref<16x128xf32, #tpu.memory_space<vmem>>, vector<16x128xf32>
      %c0_73 = arith.constant 0 : index
      %c0_74 = arith.constant 0 : index
      %158 = vector.load %arg3[%c0_73, %c0_74] : memref<1x128xf32, #tpu.memory_space<vmem>>, vector<1x128xf32>
      %c0_75 = arith.constant 0 : index
      %c0_76 = arith.constant 0 : index
      %159 = vector.load %arg4[%c0_75, %c0_76] : memref<1x128xf32, #tpu.memory_space<vmem>>, vector<1x128xf32>
      %cst_77 = arith.constant dense<0.000000e+00> : vector<16xf32>
      %160 = vector.multi_reduction <add>, %157, %cst_77 [1] : vector<16x128xf32> to vector<16xf32>
      %161 = vector.shape_cast %160 : vector<16xf32> to vector<16x1xf32>
      %cst_78 = arith.constant 1.280000e+02 : f32
      %162 = vector.broadcast %cst_78 : f32 to vector<16x1xf32>
      %163 = arith.divf %161, %162 : vector<16x1xf32>
      %164 = vector.broadcast %163 : vector<16x1xf32> to vector<16x128xf32>
      %165 = arith.subf %157, %164 : vector<16x128xf32>
      %166 = arith.mulf %165, %165 : vector<16x128xf32>
      %cst_79 = arith.constant dense<0.000000e+00> : vector<16xf32>
      %167 = vector.multi_reduction <add>, %166, %cst_79 [1] : vector<16x128xf32> to vector<16xf32>
      %168 = vector.shape_cast %167 : vector<16xf32> to vector<16x1xf32>
      %cst_80 = arith.constant 1.280000e+02 : f32
      %169 = vector.broadcast %cst_80 : f32 to vector<16x1xf32>
      %170 = arith.divf %168, %169 : vector<16x1xf32>
      %cst_81 = arith.constant 9.99999996E-13 : f32
      %171 = vector.broadcast %cst_81 : f32 to vector<16x1xf32>
      %172 = arith.addf %170, %171 : vector<16x1xf32>
      %173 = math.rsqrt %172 : vector<16x1xf32>
      %174 = vector.broadcast %173 : vector<16x1xf32> to vector<16x128xf32>
      %175 = arith.mulf %165, %174 : vector<16x128xf32>
      %176 = vector.broadcast %158 : vector<1x128xf32> to vector<16x128xf32>
      %177 = arith.mulf %175, %176 : vector<16x128xf32>
      %178 = vector.broadcast %159 : vector<1x128xf32> to vector<16x128xf32>
      %179 = arith.addf %177, %178 : vector<16x128xf32>
      %c0_82 = arith.constant 0 : index
      %c0_83 = arith.constant 0 : index
      %180 = vector.load %arg22[%c0_82, %c0_83] : memref<16x128xf32, #tpu.memory_space<vmem>>, vector<16x128xf32>
      tpu.vector_store %arg22[%c0_82, %c0_83], %179 {strides = array<i32>} : memref<16x128xf32, #tpu.memory_space<vmem>>, vector<16x128xf32>,
    } else {
    }
    %c0 = arith.constant 0 : index
    %c0_1 = arith.constant 0 : index
    %3 = vector.load %arg22[%c0, %c0_1] : memref<16x128xf32, #tpu.memory_space<vmem>>, vector<16x128xf32>
    %4 = arith.truncf %3 : vector<16x128xf32> to vector<16x128xbf16>
    %c0_2 = arith.constant 0 : index
    %c0_3 = arith.constant 0 : index
    %c0_4 = arith.constant 0 : index
    %5 = vector.load %arg5[%c0_2, %c0_3, %c0_4] : memref<1x128x384xbf16, #tpu.memory_space<vmem>>, vector<1x128x384xbf16>
    %6 = vector.shape_cast %5 : vector<1x128x384xbf16> to vector<128x384xbf16>
    %cst = arith.constant dense<0.000000e+00> : vector<16x384xf32>
    %7 = tpu.matmul %4, %6, %cst {dimension_numbers = #tpu.dot_dimension_numbers<[1], [0], [0], [1], [0, 0, 1, 1], [], []>} : vector<16x128xbf16>, vector<128x384xbf16>, vector<16x384xf32> -> vector<16x384xf32>
    %c0_5 = arith.constant 0 : index
    %c0_6 = arith.constant 0 : index
    %c0_7 = arith.constant 0 : index
    %8 = vector.load %arg6[%c0_5, %c0_6, %c0_7] : memref<1x1x384xf32, #tpu.memory_space<vmem>>, vector<1x1x384xf32>
    %9 = vector.shape_cast %8 : vector<1x1x384xf32> to vector<1x384xf32>
    %10 = vector.broadcast %9 : vector<1x384xf32> to vector<16x384xf32>
    %11 = arith.addf %7, %10 : vector<16x384xf32>
    %c0_8 = arith.constant 0 : index
    %c0_9 = arith.constant 0 : index
    %c0_10 = arith.constant 0 : index
    %12 = vector.load %arg1[%c0_8, %c0_9, %c0_10] : memref<2x1x8xf32, #tpu.memory_space<vmem>>, vector<2x1x8xf32>
    %13 = vector.extract_strided_slice %11 {offsets = [0, 0], sizes = [16, 64], strides = [1, 1]} : vector<16x384xf32> to vector<16x64xf32>
    %14 = vector.shape_cast %13 : vector<16x64xf32> to vector<2x8x64xf32>
    %15 = arith.truncf %14 : vector<2x8x64xf32> to vector<2x8x64xbf16>
    %16 = vector.extract_strided_slice %11 {offsets = [0, 128], sizes = [16, 64], strides = [1, 1]} : vector<16x384xf32> to vector<16x64xf32>
    %17 = vector.shape_cast %16 : vector<16x64xf32> to vector<2x8x64xf32>
    %18 = arith.truncf %17 : vector<2x8x64xf32> to vector<2x8x64xbf16>
    %19 = vector.extract_strided_slice %11 {offsets = [0, 256], sizes = [16, 64], strides = [1, 1]} : vector<16x384xf32> to vector<16x64xf32>
    %20 = vector.shape_cast %19 : vector<16x64xf32> to vector<2x8x64xf32>
    %21 = arith.truncf %20 : vector<2x8x64xf32> to vector<2x8x64xbf16>
    "tpu.trace_start"() <{level = 10 : i32, message = "bqd,bkd->bqk"}> : () -> ()
    %cst_11 = arith.constant dense<0.000000e+00> : vector<2x8x8xf32>
    %22 = tpu.matmul %15, %18, %cst_11 {dimension_numbers = #tpu.dot_dimension_numbers<[2], [2], [1], [1], [0, 0, 0, 1, 1, 1], [0], [0]>} : vector<2x8x64xbf16>, vector<2x8x64xbf16>, vector<2x8x8xf32> -> vector<2x8x8xf32>
    "tpu.trace_stop"() : () -> ()
    %cst_12 = arith.constant 1.250000e-01 : f32
    %23 = vector.broadcast %cst_12 : f32 to vector<2x8x8xf32>
    %24 = arith.mulf %22, %23 : vector<2x8x8xf32>
    %25 = vector.broadcast %12 : vector<2x1x8xf32> to vector<2x8x8xf32>
    %26 = arith.addf %24, %25 : vector<2x8x8xf32>
    %cst_13 = arith.constant dense<0xFF800000> : vector<2x8xf32>
    %27 = vector.multi_reduction <maximumf>, %26, %cst_13 [2] : vector<2x8x8xf32> to vector<2x8xf32>
    %28 = vector.shape_cast %27 : vector<2x8xf32> to vector<2x8x1xf32>
    %29 = vector.broadcast %28 : vector<2x8x1xf32> to vector<2x8x8xf32>
    %30 = arith.subf %26, %29 : vector<2x8x8xf32>
    %31 = math.exp %30 : vector<2x8x8xf32>
    %cst_14 = arith.constant dense<0.000000e+00> : vector<2x8xf32>
    %32 = vector.multi_reduction <add>, %31, %cst_14 [2] : vector<2x8x8xf32> to vector<2x8xf32>
    %33 = vector.shape_cast %32 : vector<2x8xf32> to vector<2x8x1xf32>
    %34 = vector.broadcast %33 : vector<2x8x1xf32> to vector<2x8x8xf32>
    %35 = arith.divf %31, %34 : vector<2x8x8xf32>
    %36 = arith.truncf %35 : vector<2x8x8xf32> to vector<2x8x8xbf16>
    "tpu.trace_start"() <{level = 10 : i32, message = "bqk,bkd->bqd"}> : () -> ()
    %cst_15 = arith.constant dense<0.000000e+00> : vector<2x8x64xf32>
    %37 = tpu.matmul %36, %21, %cst_15 {dimension_numbers = #tpu.dot_dimension_numbers<[2], [1], [1], [2], [0, 0, 0, 1, 1, 2], [0], [0]>} : vector<2x8x8xbf16>, vector<2x8x64xbf16>, vector<2x8x64xf32> -> vector<2x8x64xf32>
    "tpu.trace_stop"() : () -> ()
    %38 = vector.shape_cast %37 : vector<2x8x64xf32> to vector<16x64xf32>
    %39 = vector.extract_strided_slice %11 {offsets = [0, 64], sizes = [16, 64], strides = [1, 1]} : vector<16x384xf32> to vector<16x64xf32>
    %40 = vector.shape_cast %39 : vector<16x64xf32> to vector<2x8x64xf32>
    %41 = arith.truncf %40 : vector<2x8x64xf32> to vector<2x8x64xbf16>
    %42 = vector.extract_strided_slice %11 {offsets = [0, 192], sizes = [16, 64], strides = [1, 1]} : vector<16x384xf32> to vector<16x64xf32>
    %43 = vector.shape_cast %42 : vector<16x64xf32> to vector<2x8x64xf32>
    %44 = arith.truncf %43 : vector<2x8x64xf32> to vector<2x8x64xbf16>
    %45 = vector.extract_strided_slice %11 {offsets = [0, 320], sizes = [16, 64], strides = [1, 1]} : vector<16x384xf32> to vector<16x64xf32>
    %46 = vector.shape_cast %45 : vector<16x64xf32> to vector<2x8x64xf32>
    %47 = arith.truncf %46 : vector<2x8x64xf32> to vector<2x8x64xbf16>
    "tpu.trace_start"() <{level = 10 : i32, message = "bqd,bkd->bqk"}> : () -> ()
    %cst_16 = arith.constant dense<0.000000e+00> : vector<2x8x8xf32>
    %48 = tpu.matmul %41, %44, %cst_16 {dimension_numbers = #tpu.dot_dimension_numbers<[2], [2], [1], [1], [0, 0, 0, 1, 1, 1], [0], [0]>} : vector<2x8x64xbf16>, vector<2x8x64xbf16>, vector<2x8x8xf32> -> vector<2x8x8xf32>
    "tpu.trace_stop"() : () -> ()
    %cst_17 = arith.constant 1.250000e-01 : f32
    %49 = vector.broadcast %cst_17 : f32 to vector<2x8x8xf32>
    %50 = arith.mulf %48, %49 : vector<2x8x8xf32>
    %51 = vector.broadcast %12 : vector<2x1x8xf32> to vector<2x8x8xf32>
    %52 = arith.addf %50, %51 : vector<2x8x8xf32>
    %cst_18 = arith.constant dense<0xFF800000> : vector<2x8xf32>
    %53 = vector.multi_reduction <maximumf>, %52, %cst_18 [2] : vector<2x8x8xf32> to vector<2x8xf32>
    %54 = vector.shape_cast %53 : vector<2x8xf32> to vector<2x8x1xf32>
    %55 = vector.broadcast %54 : vector<2x8x1xf32> to vector<2x8x8xf32>
    %56 = arith.subf %52, %55 : vector<2x8x8xf32>
    %57 = math.exp %56 : vector<2x8x8xf32>
    %cst_19 = arith.constant dense<0.000000e+00> : vector<2x8xf32>
    %58 = vector.multi_reduction <add>, %57, %cst_19 [2] : vector<2x8x8xf32> to vector<2x8xf32>
    %59 = vector.shape_cast %58 : vector<2x8xf32> to vector<2x8x1xf32>
    %60 = vector.broadcast %59 : vector<2x8x1xf32> to vector<2x8x8xf32>
    %61 = arith.divf %57, %60 : vector<2x8x8xf32>
    %62 = arith.truncf %61 : vector<2x8x8xf32> to vector<2x8x8xbf16>
    "tpu.trace_start"() <{level = 10 : i32, message = "bqk,bkd->bqd"}> : () -> ()
    %cst_20 = arith.constant dense<0.000000e+00> : vector<2x8x64xf32>
    %63 = tpu.matmul %62, %47, %cst_20 {dimension_numbers = #tpu.dot_dimension_numbers<[2], [1], [1], [2], [0, 0, 0, 1, 1, 2], [0], [0]>} : vector<2x8x8xbf16>, vector<2x8x64xbf16>, vector<2x8x64xf32> -> vector<2x8x64xf32>
    "tpu.trace_stop"() : () -> ()
    %64 = vector.shape_cast %63 : vector<2x8x64xf32> to vector<16x64xf32>
    %65 = tpu.concatenate %38, %64 in 1 : vector<16x64xf32>, vector<16x64xf32> -> vector<16x128xf32>
    %66 = arith.truncf %65 : vector<16x128xf32> to vector<16x128xbf16>
    %c0_21 = arith.constant 0 : index
    %c0_22 = arith.constant 0 : index
    %c0_23 = arith.constant 0 : index
    %67 = vector.load %arg7[%c0_21, %c0_22, %c0_23] : memref<1x128x128xbf16, #tpu.memory_space<vmem>>, vector<1x128x128xbf16>
    %68 = vector.shape_cast %67 : vector<1x128x128xbf16> to vector<128x128xbf16>
    %cst_24 = arith.constant dense<0.000000e+00> : vector<16x128xf32>
    %69 = tpu.matmul %66, %68, %cst_24 {dimension_numbers = #tpu.dot_dimension_numbers<[1], [0], [0], [1], [0, 0, 1, 1], [], []>} : vector<16x128xbf16>, vector<128x128xbf16>, vector<16x128xf32> -> vector<16x128xf32>
    %c0_25 = arith.constant 0 : index
    %c0_26 = arith.constant 0 : index
    %c0_27 = arith.constant 0 : index
    %70 = vector.load %arg8[%c0_25, %c0_26, %c0_27] : memref<1x1x128xf32, #tpu.memory_space<vmem>>, vector<1x1x128xf32>
    %71 = vector.shape_cast %70 : vector<1x1x128xf32> to vector<1x128xf32>
    %72 = vector.broadcast %71 : vector<1x128xf32> to vector<16x128xf32>
    %73 = arith.addf %69, %72 : vector<16x128xf32>
    %74 = arith.addf %73, %3 : vector<16x128xf32>
    %c0_28 = arith.constant 0 : index
    %c0_29 = arith.constant 0 : index
    %c0_30 = arith.constant 0 : index
    %75 = vector.load %arg9[%c0_28, %c0_29, %c0_30] : memref<1x1x128xf32, #tpu.memory_space<vmem>>, vector<1x1x128xf32>
    %76 = vector.shape_cast %75 : vector<1x1x128xf32> to vector<1x128xf32>
    %c0_31 = arith.constant 0 : index
    %c0_32 = arith.constant 0 : index
    %c0_33 = arith.constant 0 : index
    %77 = vector.load %arg10[%c0_31, %c0_32, %c0_33] : memref<1x1x128xf32, #tpu.memory_space<vmem>>, vector<1x1x128xf32>
    %78 = vector.shape_cast %77 : vector<1x1x128xf32> to vector<1x128xf32>
    %cst_34 = arith.constant dense<0.000000e+00> : vector<16xf32>
    %79 = vector.multi_reduction <add>, %74, %cst_34 [1] : vector<16x128xf32> to vector<16xf32>
    %80 = vector.shape_cast %79 : vector<16xf32> to vector<16x1xf32>
    %cst_35 = arith.constant 1.280000e+02 : f32
    %81 = vector.broadcast %cst_35 : f32 to vector<16x1xf32>
    %82 = arith.divf %80, %81 : vector<16x1xf32>
    %83 = vector.broadcast %82 : vector<16x1xf32> to vector<16x128xf32>
    %84 = arith.subf %74, %83 : vector<16x128xf32>
    %85 = arith.mulf %84, %84 : vector<16x128xf32>
    %cst_36 = arith.constant dense<0.000000e+00> : vector<16xf32>
    %86 = vector.multi_reduction <add>, %85, %cst_36 [1] : vector<16x128xf32> to vector<16xf32>
    %87 = vector.shape_cast %86 : vector<16xf32> to vector<16x1xf32>
    %cst_37 = arith.constant 1.280000e+02 : f32
    %88 = vector.broadcast %cst_37 : f32 to vector<16x1xf32>
    %89 = arith.divf %87, %88 : vector<16x1xf32>
    %cst_38 = arith.constant 9.99999996E-13 : f32
    %90 = vector.broadcast %cst_38 : f32 to vector<16x1xf32>
    %91 = arith.addf %89, %90 : vector<16x1xf32>
    %92 = math.rsqrt %91 : vector<16x1xf32>
    %93 = vector.broadcast %92 : vector<16x1xf32> to vector<16x128xf32>
    %94 = arith.mulf %84, %93 : vector<16x128xf32>
    %95 = vector.broadcast %76 : vector<1x128xf32> to vector<16x128xf32>
    %96 = arith.mulf %94, %95 : vector<16x128xf32>
    %97 = vector.broadcast %78 : vector<1x128xf32> to vector<16x128xf32>
    %98 = arith.addf %96, %97 : vector<16x128xf32>
    %99 = arith.truncf %98 : vector<16x128xf32> to vector<16x128xbf16>
    %c0_39 = arith.constant 0 : index
    %c0_40 = arith.constant 0 : index
    %c0_41 = arith.constant 0 : index
    %100 = vector.load %arg11[%c0_39, %c0_40, %c0_41] : memref<1x128x512xbf16, #tpu.memory_space<vmem>>, vector<1x128x512xbf16>
    %101 = vector.shape_cast %100 : vector<1x128x512xbf16> to vector<128x512xbf16>
    %cst_42 = arith.constant dense<0.000000e+00> : vector<16x512xf32>
    %102 = tpu.matmul %99, %101, %cst_42 {dimension_numbers = #tpu.dot_dimension_numbers<[1], [0], [0], [1], [0, 0, 1, 1], [], []>} : vector<16x128xbf16>, vector<128x512xbf16>, vector<16x512xf32> -> vector<16x512xf32>
    %c0_43 = arith.constant 0 : index
    %c0_44 = arith.constant 0 : index
    %c0_45 = arith.constant 0 : index
    %103 = vector.load %arg12[%c0_43, %c0_44, %c0_45] : memref<1x1x512xf32, #tpu.memory_space<vmem>>, vector<1x1x512xf32>
    %104 = vector.shape_cast %103 : vector<1x1x512xf32> to vector<1x512xf32>
    %105 = vector.broadcast %104 : vector<1x512xf32> to vector<16x512xf32>
    %106 = arith.addf %102, %105 : vector<16x512xf32>
    %107 = arith.mulf %106, %106 : vector<16x512xf32>
    %108 = arith.mulf %106, %107 : vector<16x512xf32>
    %cst_46 = arith.constant 4.471500e-02 : f32
    %109 = vector.broadcast %cst_46 : f32 to vector<16x512xf32>
    %110 = arith.mulf %109, %108 : vector<16x512xf32>
    %111 = arith.addf %106, %110 : vector<16x512xf32>
    %cst_47 = arith.constant 0.797884583 : f32
    %112 = vector.broadcast %cst_47 : f32 to vector<16x512xf32>
    %113 = arith.mulf %112, %111 : vector<16x512xf32>
    %114 = math.tanh %113 : vector<16x512xf32>
    %cst_48 = arith.constant 1.000000e+00 : f32
    %115 = vector.broadcast %cst_48 : f32 to vector<16x512xf32>
    %116 = arith.addf %115, %114 : vector<16x512xf32>
    %cst_49 = arith.constant 5.000000e-01 : f32
    %117 = vector.broadcast %cst_49 : f32 to vector<16x512xf32>
    %118 = arith.mulf %117, %116 : vector<16x512xf32>
    %119 = arith.mulf %106, %118 : vector<16x512xf32>
    %120 = arith.truncf %119 : vector<16x512xf32> to vector<16x512xbf16>
    %c0_50 = arith.constant 0 : index
    %c0_51 = arith.constant 0 : index
    %c0_52 = arith.constant 0 : index
    %121 = vector.load %arg13[%c0_50, %c0_51, %c0_52] : memref<1x512x128xbf16, #tpu.memory_space<vmem>>, vector<1x512x128xbf16>
    %122 = vector.shape_cast %121 : vector<1x512x128xbf16> to vector<512x128xbf16>
    %cst_53 = arith.constant dense<0.000000e+00> : vector<16x128xf32>
    %123 = tpu.matmul %120, %122, %cst_53 {dimension_numbers = #tpu.dot_dimension_numbers<[1], [0], [0], [1], [0, 0, 1, 1], [], []>} : vector<16x512xbf16>, vector<512x128xbf16>, vector<16x128xf32> -> vector<16x128xf32>
    %c0_54 = arith.constant 0 : index
    %c0_55 = arith.constant 0 : index
    %c0_56 = arith.constant 0 : index
    %124 = vector.load %arg14[%c0_54, %c0_55, %c0_56] : memref<1x1x128xf32, #tpu.memory_space<vmem>>, vector<1x1x128xf32>
    %125 = vector.shape_cast %124 : vector<1x1x128xf32> to vector<1x128xf32>
    %126 = vector.broadcast %125 : vector<1x128xf32> to vector<16x128xf32>
    %127 = arith.addf %123, %126 : vector<16x128xf32>
    %128 = arith.addf %127, %98 : vector<16x128xf32>
    %c0_57 = arith.constant 0 : index
    %c0_58 = arith.constant 0 : index
    %c0_59 = arith.constant 0 : index
    %129 = vector.load %arg15[%c0_57, %c0_58, %c0_59] : memref<1x1x128xf32, #tpu.memory_space<vmem>>, vector<1x1x128xf32>
    %130 = vector.shape_cast %129 : vector<1x1x128xf32> to vector<1x128xf32>
    %c0_60 = arith.constant 0 : index
    %c0_61 = arith.constant 0 : index
    %c0_62 = arith.constant 0 : index
    %131 = vector.load %arg16[%c0_60, %c0_61, %c0_62] : memref<1x1x128xf32, #tpu.memory_space<vmem>>, vector<1x1x128xf32>
    %132 = vector.shape_cast %131 : vector<1x1x128xf32> to vector<1x128xf32>
    %cst_63 = arith.constant dense<0.000000e+00> : vector<16xf32>
    %133 = vector.multi_reduction <add>, %128, %cst_63 [1] : vector<16x128xf32> to vector<16xf32>
    %134 = vector.shape_cast %133 : vector<16xf32> to vector<16x1xf32>
    %cst_64 = arith.constant 1.280000e+02 : f32
    %135 = vector.broadcast %cst_64 : f32 to vector<16x1xf32>
    %136 = arith.divf %134, %135 : vector<16x1xf32>
    %137 = vector.broadcast %136 : vector<16x1xf32> to vector<16x128xf32>
    %138 = arith.subf %128, %137 : vector<16x128xf32>
    %139 = arith.mulf %138, %138 : vector<16x128xf32>
    %cst_65 = arith.constant dense<0.000000e+00> : vector<16xf32>
    %140 = vector.multi_reduction <add>, %139, %cst_65 [1] : vector<16x128xf32> to vector<16xf32>
    %141 = vector.shape_cast %140 : vector<16xf32> to vector<16x1xf32>
    %cst_66 = arith.constant 1.280000e+02 : f32
    %142 = vector.broadcast %cst_66 : f32 to vector<16x1xf32>
    %143 = arith.divf %141, %142 : vector<16x1xf32>
    %cst_67 = arith.constant 9.99999996E-13 : f32
    %144 = vector.broadcast %cst_67 : f32 to vector<16x1xf32>
    %145 = arith.addf %143, %144 : vector<16x1xf32>
    %146 = math.rsqrt %145 : vector<16x1xf32>
    %147 = vector.broadcast %146 : vector<16x1xf32> to vector<16x128xf32>
    %148 = arith.mulf %138, %147 : vector<16x128xf32>
    %149 = vector.broadcast %130 : vector<1x128xf32> to vector<16x128xf32>
    %150 = arith.mulf %148, %149 : vector<16x128xf32>
    %151 = vector.broadcast %132 : vector<1x128xf32> to vector<16x128xf32>
    %152 = arith.addf %150, %151 : vector<16x128xf32>
    %c0_68 = arith.constant 0 : index
    %c0_69 = arith.constant 0 : index
    %153 = vector.load %arg22[%c0_68, %c0_69] : memref<16x128xf32, #tpu.memory_space<vmem>>, vector<16x128xf32>
    tpu.vector_store %arg22[%c0_68, %c0_69], %152 {strides = array<i32>} : memref<16x128xf32, #tpu.memory_space<vmem>>, vector<16x128xf32>,
    %c1_i32 = arith.constant 1 : i32
    %154 = arith.cmpi eq, %arg0, %c1_i32 : i32
    %155 = arith.extui %154 : i1 to i32
    %c0_i32_70 = arith.constant 0 : i32
    %156 = arith.cmpi ne, %155, %c0_i32_70 : i32
    scf.if %156 {
      %157 = vector.extract_strided_slice %152 {offsets = [0, 0], sizes = [1, 128], strides = [1, 1]} : vector<16x128xf32> to vector<1x128xf32>
      %158 = vector.extract_strided_slice %152 {offsets = [8, 0], sizes = [1, 128], strides = [1, 1]} : vector<16x128xf32> to vector<1x128xf32>
      %159 = tpu.concatenate %157, %158 in 0 : vector<1x128xf32>, vector<1x128xf32> -> vector<2x128xf32>
      %160 = arith.truncf %159 : vector<2x128xf32> to vector<2x128xbf16>
      %c0_71 = arith.constant 0 : index
      %c0_72 = arith.constant 0 : index
      %161 = vector.load %arg17[%c0_71, %c0_72] : memref<128x128xbf16, #tpu.memory_space<vmem>>, vector<128x128xbf16>
      %cst_73 = arith.constant dense<0.000000e+00> : vector<2x128xf32>
      %162 = tpu.matmul %160, %161, %cst_73 {dimension_numbers = #tpu.dot_dimension_numbers<[1], [0], [0], [1], [0, 0, 1, 1], [], []>} : vector<2x128xbf16>, vector<128x128xbf16>, vector<2x128xf32> -> vector<2x128xf32>
      %c0_74 = arith.constant 0 : index
      %c0_75 = arith.constant 0 : index
      %163 = vector.load %arg18[%c0_74, %c0_75] : memref<1x128xf32, #tpu.memory_space<vmem>>, vector<1x128xf32>
      %164 = vector.broadcast %163 : vector<1x128xf32> to vector<2x128xf32>
      %165 = arith.addf %162, %164 : vector<2x128xf32>
      %166 = math.tanh %165 : vector<2x128xf32>
      %c0_76 = arith.constant 0 : index
      %c0_77 = arith.constant 0 : index
      %167 = vector.load %arg19[%c0_76, %c0_77] : memref<1x128xf32, #tpu.memory_space<vmem>>, vector<1x128xf32>
      %168 = vector.broadcast %167 : vector<1x128xf32> to vector<2x128xf32>
      %169 = arith.mulf %166, %168 : vector<2x128xf32>
      %cst_78 = arith.constant dense<0.000000e+00> : vector<2xf32>
      %170 = vector.multi_reduction <add>, %169, %cst_78 [1] : vector<2x128xf32> to vector<2xf32>
      %171 = vector.shape_cast %170 : vector<2xf32> to vector<2x1xf32>
      %c0_79 = arith.constant 0 : index
      %c0_80 = arith.constant 0 : index
      %172 = vector.load %arg20[%c0_79, %c0_80] : memref<1x1xf32, #tpu.memory_space<vmem>>, vector<1x1xf32>
      %173 = vector.broadcast %172 : vector<1x1xf32> to vector<2x1xf32>
      %174 = arith.addf %171, %173 : vector<2x1xf32>
      %175 = vector.shape_cast %174 : vector<2x1xf32> to vector<2x1xf32>
      %176 = vector.broadcast %175 : vector<2x1xf32> to vector<2x128xf32>
      %c0_81 = arith.constant 0 : index
      %c0_82 = arith.constant 0 : index
      %177 = vector.load %arg21[%c0_81, %c0_82] : memref<2x128xf32, #tpu.memory_space<vmem>>, vector<2x128xf32>
      tpu.vector_store %arg21[%c0_81, %c0_82], %176 {strides = array<i32>} : memref<2x128xf32, #tpu.memory_space<vmem>>, vector<2x128xf32>,
    } else {
    }
    return
  }
  func.func @transform_0(%arg0: i32) -> (i32, i32, i32) {
    %c0_i32 = arith.constant 0 : i32
    %c0_i32_0 = arith.constant 0 : i32
    %c0_i32_1 = arith.constant 0 : i32
    %c0_i32_2 = arith.constant 0 : i32
    return %c0_i32, %c0_i32_0, %c0_i32_1 : i32, i32, i32
  }
  func.func @transform_1(%arg0: i32) -> (i32, i32) {
    %c0_i32 = arith.constant 0 : i32
    %c0_i32_0 = arith.constant 0 : i32
    %c0_i32_1 = arith.constant 0 : i32
    return %c0_i32, %c0_i32_0 : i32, i32
  }
  func.func @transform_2(%arg0: i32) -> (i32, i32) {
    %c0_i32 = arith.constant 0 : i32
    %c0_i32_0 = arith.constant 0 : i32
    %c0_i32_1 = arith.constant 0 : i32
    return %c0_i32, %c0_i32_0 : i32, i32
  }
  func.func @transform_3(%arg0: i32) -> (i32, i32) {
    %c0_i32 = arith.constant 0 : i32
    %c0_i32_0 = arith.constant 0 : i32
    %c0_i32_1 = arith.constant 0 : i32
    return %c0_i32, %c0_i32_0 : i32, i32
  }
  func.func @transform_4(%arg0: i32) -> (i32, i32, i32) {
    %c0_i32 = arith.constant 0 : i32
    %c0_i32_0 = arith.constant 0 : i32
    %c0_i32_1 = arith.constant 0 : i32
    return %arg0, %c0_i32, %c0_i32_0 : i32, i32, i32
  }
  func.func @transform_5(%arg0: i32) -> (i32, i32, i32) {
    %c0_i32 = arith.constant 0 : i32
    %c0_i32_0 = arith.constant 0 : i32
    %c0_i32_1 = arith.constant 0 : i32
    return %arg0, %c0_i32, %c0_i32_0 : i32, i32, i32
  }
  func.func @transform_6(%arg0: i32) -> (i32, i32, i32) {
    %c0_i32 = arith.constant 0 : i32
    %c0_i32_0 = arith.constant 0 : i32
    %c0_i32_1 = arith.constant 0 : i32
    return %arg0, %c0_i32, %c0_i32_0 : i32, i32, i32
  }
  func.func @transform_7(%arg0: i32) -> (i32, i32, i32) {
    %c0_i32 = arith.constant 0 : i32
    %c0_i32_0 = arith.constant 0 : i32
    %c0_i32_1 = arith.constant 0 : i32
    return %arg0, %c0_i32, %c0_i32_0 : i32, i32, i32
  }
  func.func @transform_8(%arg0: i32) -> (i32, i32, i32) {
    %c0_i32 = arith.constant 0 : i32
    %c0_i32_0 = arith.constant 0 : i32
    %c0_i32_1 = arith.constant 0 : i32
    return %arg0, %c0_i32, %c0_i32_0 : i32, i32, i32
  }
  func.func @transform_9(%arg0: i32) -> (i32, i32, i32) {
    %c0_i32 = arith.constant 0 : i32
    %c0_i32_0 = arith.constant 0 : i32
    %c0_i32_1 = arith.constant 0 : i32
    return %arg0, %c0_i32, %c0_i32_0 : i32, i32, i32
  }
  func.func @transform_10(%arg0: i32) -> (i32, i32, i32) {
    %c0_i32 = arith.constant 0 : i32
    %c0_i32_0 = arith.constant 0 : i32
    %c0_i32_1 = arith.constant 0 : i32
    return %arg0, %c0_i32, %c0_i32_0 : i32, i32, i32
  }
  func.func @transform_11(%arg0: i32) -> (i32, i32, i32) {
    %c0_i32 = arith.constant 0 : i32
    %c0_i32_0 = arith.constant 0 : i32
    %c0_i32_1 = arith.constant 0 : i32
    return %arg0, %c0_i32, %c0_i32_0 : i32, i32, i32
  }
  func.func @transform_12(%arg0: i32) -> (i32, i32, i32) {
    %c0_i32 = arith.constant 0 : i32
    %c0_i32_0 = arith.constant 0 : i32
    %c0_i32_1 = arith.constant 0 : i32
    return %arg0, %c0_i32, %c0_i32_0 : i32, i32, i32
  }
  func.func @transform_13(%arg0: i32) -> (i32, i32, i32) {
    %c0_i32 = arith.constant 0 : i32
    %c0_i32_0 = arith.constant 0 : i32
    %c0_i32_1 = arith.constant 0 : i32
    return %arg0, %c0_i32, %c0_i32_0 : i32, i32, i32
  }
  func.func @transform_14(%arg0: i32) -> (i32, i32, i32) {
    %c0_i32 = arith.constant 0 : i32
    %c0_i32_0 = arith.constant 0 : i32
    %c0_i32_1 = arith.constant 0 : i32
    return %arg0, %c0_i32, %c0_i32_0 : i32, i32, i32
  }
  func.func @transform_15(%arg0: i32) -> (i32, i32, i32) {
    %c0_i32 = arith.constant 0 : i32
    %c0_i32_0 = arith.constant 0 : i32
    %c0_i32_1 = arith.constant 0 : i32
    return %arg0, %c0_i32, %c0_i32_0 : i32, i32, i32
  }
  func.func @transform_16(%arg0: i32) -> (i32, i32) {
    %c0_i32 = arith.constant 0 : i32
    %c0_i32_0 = arith.constant 0 : i32
    %c0_i32_1 = arith.constant 0 : i32
    return %c0_i32, %c0_i32_0 : i32, i32
  }
  func.func @transform_17(%arg0: i32) -> (i32, i32) {
    %c0_i32 = arith.constant 0 : i32
    %c0_i32_0 = arith.constant 0 : i32
    %c0_i32_1 = arith.constant 0 : i32
    return %c0_i32, %c0_i32_0 : i32, i32
  }
  func.func @transform_18(%arg0: i32) -> (i32, i32) {
    %c0_i32 = arith.constant 0 : i32
    %c0_i32_0 = arith.constant 0 : i32
    %c0_i32_1 = arith.constant 0 : i32
    return %c0_i32, %c0_i32_0 : i32, i32
  }
  func.func @transform_19(%arg0: i32) -> (i32, i32) {
    %c0_i32 = arith.constant 0 : i32
    %c0_i32_0 = arith.constant 0 : i32
    %c0_i32_1 = arith.constant 0 : i32
    return %c0_i32, %c0_i32_0 : i32, i32
  }
  func.func @transform_20(%arg0: i32) -> (i32, i32) {
    %c0_i32 = arith.constant 0 : i32
    %c0_i32_0 = arith.constant 0 : i32
    %c0_i32_1 = arith.constant 0 : i32
    return %c0_i32, %c0_i32_0 : i32, i32
  }
}

</mosaic_0001>

<bundles_post_ra>
// kernel: bert_base_uncased.1
= control target key start
LH: loop header
LB: loop body
LE: loop exit
PB: predicated region body
PF: predicated region fallthrough
CT: control target
= control target key end

     0   :  { %s4345_s0 = inlined_call_operand.vmem [shape: f32[2,1,8], index: 0, kind: input, shape index: {}]   ;;  %s4346_s1 = inlined_call_operand.vmem [shape: f32[16,128], index: 1, kind: input, shape index: {}]   ;;  %s4347_s2 = inlined_call_operand.vmem [shape: f32[1,128], index: 2, kind: input, shape index: {}]   ;;  %s4348_s3 = inlined_call_operand.vmem [shape: f32[1,128], index: 3, kind: input, shape index: {}]   ;;  %s4349_s4 = inlined_call_operand.hbm [shape: bf16[2,128,384], index: 4, kind: input, shape index: {}]   ;;  %s4350_s5 = inlined_call_operand.vmem [shape: f32[2,1,384], index: 5, kind: input, shape index: {}]   ;;  %s4351_s6 = inlined_call_operand.vmem [shape: bf16[2,128,128], index: 6, kind: input, shape index: {}]   ;;  %s4352_s7 = inlined_call_operand.vmem [shape: f32[2,1,128], index: 7, kind: input, shape index: {}]   ;;  %s4353_s8 = inlined_call_operand.vmem [shape: f32[2,1,128], index: 8, kind: input, shape index: {}]   ;;  %s4354_s9 = inlined_call_operand.vmem [shape: f32[2,1,128], index: 9, kind: input, shape index: {}]   ;;  %s4355_s10 = inlined_call_operand.hbm [shape: bf16[2,128,512], index: 10, kind: input, shape index: {}]   ;;  %s4356_s11 = inlined_call_operand.vmem [shape: f32[2,1,512], index: 11, kind: input, shape index: {}]   ;;  %s4357_s12 = inlined_call_operand.hbm [shape: bf16[2,512,128], index: 12, kind: input, shape index: {}]   ;;  %s4358_s13 = inlined_call_operand.vmem [shape: f32[2,1,128], index: 13, kind: input, shape index: {}]   ;;  %s4359_s14 = inlined_call_operand.vmem [shape: f32[2,1,128], index: 14, kind: input, shape index: {}]   ;;  %s4360_s15 = inlined_call_operand.vmem [shape: f32[2,1,128], index: 15, kind: input, shape index: {}]   ;;  %s4361_s16 = inlined_call_operand.vmem [shape: bf16[128,128], index: 16, kind: input, shape index: {}]   ;;  %s4362_s17 = inlined_call_operand.vmem [shape: f32[1,128], index: 17, kind: input, shape index: {}]   ;;  %s4363_s18 = inlined_call_operand.vmem [shape: f32[1,128], index: 18, kind: input, shape index: {}]   ;;  %s4364_s19 = inlined_call_operand.<no memory space> [shape: f32[1,1], index: 19, kind: input, shape index: {}]   ;;  %s4365_s20 = inlined_call_operand.vmem [shape: f32[2,128], index: 20, kind: output, shape index: {}]  }
   0x1   :  { %4377 = sst [smem:[#allocation14_spill]] %s4345_s0  ;;  %v25_v0 = vstv %s4364_s19 }
   0x2   :  { %4378 = sst [smem:[#allocation15_spill]] %s4346_s1  ;;  %26 = vst [vmem:[#allocation3] sm:$0x1] %v25_v0 }
   0x3   :  { %4379 = sst [smem:[#allocation16_spill]] %s4347_s2 }
   0x4   :  { %4380 = sst [smem:[#allocation17_spill]] %s4348_s3 }
   0x5   :  { %4381 = sst [smem:[#allocation18_spill]] %s4349_s4 }
   0x6   :  { %4382 = sst [smem:[#allocation19_spill]] %s4350_s5 }
   0x7   :  { %4383 = sst [smem:[#allocation20_spill]] %s4351_s6 }
   0x8   :  { %4384 = sst [smem:[#allocation21_spill]] %s4355_s10 }
   0x9   :  { %4385 = sst [smem:[#allocation22_spill]] %s4357_s12 }
   0xa   :  { %4386 = sst [smem:[#allocation23_spill]] %s4360_s15 }
   0xb   :  { %4387 = sst [smem:[#allocation24_spill]] %s4361_s16 }
   0xc   :  { %4388 = sst [smem:[#allocation25_spill]] %s4362_s17 }
   0xd   :  { %4389 = sst [smem:[#allocation26_spill]] %s4363_s18 }
   0xe   :  { %4390 = sst [smem:[#allocation27_spill]] %s4365_s20 }
   0xf   :  { %27 = vsyncpa [#allocation5], 0 }
  0x10   :  { %29 = vsyncpa [#allocation5 + $0x1], 0 }
  0x11   :  { %30 = vsyncpa [#allocation7], 0 }
  0x12   :  { %32 = vsyncpa [#allocation7 + $0x1], 0  ;;  %s3726_s23 = smov 0   ;;  %s3728_s24 = smov 0  }
  0x13   :  { %s3730_s2 = smov 0   ;;  %s3732_s25 = smov 0  }
  0x14 LB: > { %4391 = sst [smem:[#allocation11_spill]] %s3596_s2  ;;  %s3745_s19 = sadd.s32 4294967295, %s3600_s25   ;;  %s3600_s25 = sphi %s3732_s25, %s4419_s25   ;;  %s3596_s2 = sphi %s3730_s2, %s4421_s2   ;;  %s3592_s24 = sphi %s3728_s24, %s4423_s24   ;;  %s3588_s23 = sphi %s3726_s23, %s4422_s23  }
  0x15   : > { %s3748_s3 = sadd.s32 1, %s3600_s25   ;;  %s129_s27 = sadd.s32 1, %s3596_s2 }
  0x16   : > { %4392 = sst [smem:[#allocation12_spill]] %s3748_s3  ;;  %s126_s26 = ssub.s32 %s3600_s25, %s3748_s3 }
  0x17   : > { %p127_p0 = scmp.eq.s32.totalorder %s126_s26, 0  ;;  %p136_p1 = scmp.ne.s32.totalorder %s3596_s2, %s3592_s24 }
  0x18   : > { %p137_p2 = scmp.eq.s32.totalorder %s3600_s25, 0  ;;  %p142_p3 = scmp.ne.s32.totalorder %s3592_s24, %s3588_s23 }
  0x19   : > { %s3758_s28 = scalar_select %p127_p0, %s3596_s2, %s129_s27  }
  0x1a   : > { %p138_p4 = por %p137_p2, %p136_p1  ;;  %p143_p5 = scmp.eq.s32.totalorder %s3745_s19, 0 }
  0x1b   : > { %4393 = sst [smem:[#allocation13_spill]] %s3758_s28  ;;  %p3246_p6 = scmp.lt.s32.totalorder %s3600_s25, 2 }
  0x1c   : > { %p3762_p7 = por %p143_p5, %p142_p3  ;;  %s3767_s29 = sand.u32 1, %s3596_s2  }
  0x1d   : > { %p3769_p8 = pnand %p3246_p6, %p138_p4  ;;  %s635_s0 = sand.u32 1, %s3600_s25  }
  0x1e   : > { %s4394_s4 = scalar_select %p3762_p7, 1, 0 }
  0x1f   : > { %s4372_s21 = sshll.u32 %s3767_s29, 8  ;;  %s4373_s1 = sshll.u32 %s3600_s25, 12 }
  0x20   : > { %s639_s22 = scalar_lea.vmem [#allocation6], %s4372_s21  ;;  %s4396_s10 = sld [smem:[#allocation21_spill]] }
  0x21   : > { %s646_s23 = sshll.u32 %s639_s22, 4  ;;  %s3787_s2 = scalar_lea.sflag [#allocation7], %s635_s0  ;;  %s3785_s23 = int_to_ptr.vmem [resolvable:$true] %s646_s23 }
  0x22   : > { %p3793_p10 = pneg %p3769_p8 }
  0x26   : > { %s3783_s28 = scalar_lea.hbm %s4396_s10, %s4373_s1  ;;  %s3477_s27 = scalar_lea.hbm %s4396_s10, 8192 }
  0x27   : > { %s3472_s3 = scalar_lea.hbm %s3783_s28, 4096  ;;  %p3478_p13 = scmp.lt.u32.totalorder %s3783_s28, %s4396_s10 }
  0x28   : > { %p3473_p9 = scmp.ne.s32.totalorder %s3783_s28, %s3472_s3  ;;  %p3479_p0 = scmp.lt.u32.totalorder %s3477_s27, %s3472_s3 }
  0x29   : > { %p3481_p2 = scmp.lt.u32.totalorder %s3472_s3, %s3783_s28 }
  0x2a   : > { %p3475_p11 = pnand %p3793_p10, %p3473_p9  ;;  %p3480_p1 = por %p3479_p0, %p3478_p13 }
  0x2c   : > { %p3476_p12 = pneg %p3475_p11  ;;  %p3482_p3 = por %p3481_p2, %p3480_p1 }
  0x2e   : > { %p3483_p4 = pnand %p3482_p3, %p3476_p12 }
  0x30   : > { %3486 = shalt.err (!%p3483_p4)
}
  0x31   : > { %s3487_s0 = scalar_lea.vmem %s3785_s23, 4096  ;;  %s3602_s22 = smov [#allocation6]  }
  0x32   : > { %p3488_p5 = scmp.ne.s32.totalorder %s3785_s23, %s3487_s0  ;;  %s3492_s26 = sshll.u32 %s3602_s22, 4  ;;  %s3493_s26 = int_to_ptr.vmem [resolvable:$false] %s3492_s26 }
  0x33   : > { %s3494_s20 = scalar_lea.vmem %s3493_s26, 8192  ;;  %p3495_p11 = scmp.lt.s32.totalorder %s3785_s23, %s3493_s26 }
  0x34   : > { %p3490_p6 = pnand %p3488_p5, %p3793_p10  ;;  %p3496_p7 = scmp.lt.s32.totalorder %s3494_s20, %s3487_s0 }
  0x36   : > { %p3491_p9 = pneg %p3490_p6  ;;  %p3497_p13 = por %p3496_p7, %p3495_p11 }
  0x38   : > { %p3498_p0 = pnand %p3497_p13, %p3491_p9 }
  0x3a   : > { %3501 = shalt.err (!%p3498_p0)
}
  0x3b   : > { %s3603_s3 = smov 256   ;;  %s3604_s1 = smov 16  }
  0x3c   : > { %3242 = dma.hbm_to_vmem [thread:$0]  (!%p3769_p8), %s3783_s28, 4096, %s3785_s23, %s3787_s2, %s3603_s3, %s3603_s3, %s3604_s1  }
  0x3d   : > { %s4398_s27 = sshll.u32 %s3600_s25, 12  ;;  %s4399_s12 = sld [smem:[#allocation22_spill]] }
  0x3e   : > { %s4400_s20 = sshll.u32 %s3767_s29, 8  ;;  %p2893_p7 = scmp.ge.s32.totalorder %s3600_s25, 1 }
  0x3f   : > { %s667_s10 = scalar_lea.vmem [#allocation8], %s4400_s20  ;;  %p700_p12 = scmp.lt.s32.totalorder %s3600_s25, 3 }
  0x40   : > { %s674_s18 = sshll.u32 %s667_s10, 4  ;;  %s3226_s17 = smul.u32 192, %s3767_s29  ;;  %s3827_s18 = int_to_ptr.vmem [resolvable:$true] %s674_s18 }
  0x41   : > { %p3831_p1 = pnand %p2893_p7, %p700_p12  ;;  %s3227_s28 = smul.u32 3072, %s3600_s25 }
  0x42   : > { %s4402_s1 = sld [smem:[#allocation18_spill]]  ;;  %s585_s10 = scalar_lea.vmem [#allocation4], %s3226_s17 }
  0x43   : > { %s3822_s26 = scalar_lea.hbm %s4399_s12, %s4398_s27  ;;  %s592_s27 = sshll.u32 %s585_s10, 4  ;;  %s3841_s27 = int_to_ptr.vmem [resolvable:$true] %s592_s27 }
  0x44   : > { %s4401_s16 = scalar_select %p3831_p1, 1, 0 }
  0x45   : > { %s582_s22 = scalar_lea.sflag [#allocation5], %s3767_s29 }
  0x48   : > { %s3839_s0 = scalar_lea.hbm %s4402_s1, %s3227_s28  ;;  %s3507_s23 = scalar_lea.hbm %s4402_s1, 6144 }
  0x49   : > { %s3502_s20 = scalar_lea.hbm %s3839_s0, 3072  ;;  %p3508_p5 = scmp.lt.u32.totalorder %s3839_s0, %s4402_s1 }
  0x4a   : > { %p3503_p2 = scmp.ne.s32.totalorder %s3839_s0, %s3502_s20  ;;  %p3509_p6 = scmp.lt.u32.totalorder %s3507_s23, %s3502_s20 }
  0x4b   : > { %p3511_p11 = scmp.lt.u32.totalorder %s3502_s20, %s3839_s0 }
  0x4c   : > { %p3505_p3 = pnand %p3503_p2, %p3793_p10  ;;  %p3510_p9 = por %p3509_p6, %p3508_p5 }
  0x4e   : > { %p3506_p4 = pneg %p3505_p3  ;;  %p3512_p13 = por %p3511_p11, %p3510_p9 }
  0x50   : > { %p3513_p0 = pnand %p3512_p13, %p3506_p4 }
  0x52   : > { %3516 = shalt.err (!%p3513_p0)
}
  0x53   : > { %s3517_s17 = scalar_lea.vmem %s3841_s27, 3072  ;;  %s3605_s15 = smov [#allocation4]  }
  0x54   : > { %p3518_p7 = scmp.ne.s32.totalorder %s3841_s27, %s3517_s17  ;;  %s3522_s10 = sshll.u32 %s3605_s15, 4  ;;  %s3523_s10 = int_to_ptr.vmem [resolvable:$false] %s3522_s10 }
  0x55   : > { %s3524_s25 = scalar_lea.vmem %s3523_s10, 6144  ;;  %p3525_p3 = scmp.lt.s32.totalorder %s3841_s27, %s3523_s10 }
  0x56   : > { %p3520_p12 = pnand %p3518_p7, %p3793_p10  ;;  %p3526_p1 = scmp.lt.s32.totalorder %s3524_s25, %s3517_s17 }
  0x58   : > { %p3521_p2 = pneg %p3520_p12  ;;  %p3527_p5 = por %p3526_p1, %p3525_p3 }
  0x5a   : > { %p3528_p6 = pnand %p3527_p5, %p3521_p2 }
  0x5c   : > { %3531 = shalt.err (!%p3528_p6)
}
  0x5d   : > { %s3606_s20 = smov 192   ;;  %s3607_s23 = smov 12  }
  0x5e   : > { %3239 = dma.hbm_to_vmem [thread:$0]  (!%p3769_p8), %s3839_s0, 3072, %s3841_s27, %s582_s22, %s3606_s20, %s3606_s20, %s3607_s23  }
  0x5f   : > { %s3532_s28 = scalar_lea.hbm %s3822_s26, 4096  ;;  %s3537_s15 = scalar_lea.hbm %s4399_s12, 8192 }
  0x60   : > { %p3533_p4 = scmp.ne.s32.totalorder %s3822_s26, %s3532_s28  ;;  %p3538_p11 = scmp.lt.u32.totalorder %s3822_s26, %s4399_s12 }
  0x61   : > { %p3539_p13 = scmp.lt.u32.totalorder %s3537_s15, %s3532_s28  ;;  %p3541_p7 = scmp.lt.u32.totalorder %s3532_s28, %s3822_s26 }
  0x62   : > { %p3535_p1 = pnand %p3533_p4, %p3793_p10 }
  0x63   : > { %p3540_p0 = por %p3539_p13, %p3538_p11 }
  0x64   : > { %p3536_p9 = pneg %p3535_p1 }
  0x65   : > { %p3542_p12 = por %p3541_p7, %p3540_p0 }
  0x67   : > { %p3543_p2 = pnand %p3542_p12, %p3536_p9 }
  0x69   : > { %3546 = shalt.err (!%p3543_p2)
}
  0x6a   : > { %s3547_s29 = scalar_lea.vmem %s3827_s18, 4096  ;;  %s3608_s0 = smov [#allocation8]  }
  0x6b   : > { %p3548_p3 = scmp.ne.s32.totalorder %s3827_s18, %s3547_s29  ;;  %s3552_s27 = sshll.u32 %s3608_s0, 4  ;;  %s3553_s27 = int_to_ptr.vmem [resolvable:$false] %s3552_s27 }
  0x6c   : > { %s3554_s22 = scalar_lea.vmem %s3553_s27, 8192  ;;  %p3555_p4 = scmp.lt.s32.totalorder %s3827_s18, %s3553_s27 }
  0x6d   : > { %p3550_p5 = pnand %p3548_p3, %p3793_p10  ;;  %p3556_p1 = scmp.lt.s32.totalorder %s3554_s22, %s3547_s29 }
  0x6f   : > { %p3551_p6 = pneg %p3550_p5  ;;  %p3557_p11 = por %p3556_p1, %p3555_p4 }
  0x71   : > { %p3558_p13 = pnand %p3557_p11, %p3551_p6 }
  0x73   : > { %3561 = shalt.err (!%p3558_p13)
}
  0x74   : > { %s3609_s20 = smov 64   ;;  %s3610_s23 = smov 4  }
  0x75   : > { %3245 = dma.hbm_to_vmem [thread:$0]  (!%p3769_p8), %s3822_s26, 4096, %s3827_s18, %s3787_s2, %s3609_s20, %s3609_s20, %s3610_s23  }
  0x76   : > { %p4403_p10 = scmp.ne.s32.totalorder %s4401_s16, 0 }
  0x77   : > { %s706_s21 = sand.u32 (!%p4403_p10), 1, %s3592_s24   ;;  %p4404_p9 = scmp.ne.s32.totalorder (!%p4403_p10), %s4394_s4, 0 }
  0x78   : > { %704 = sbr.rel (%p4403_p10) target bundleno = 4004 (0xfa4), region = 100  ;;  %s707_s3 = scalar_lea.sflag (!%p4403_p10), [#allocation5], %s706_s21 }
  0x79   : > { %s3228_s28 = smul.u32 (!%p4403_p10), 192, %s706_s21 }
  0x7b   : > { %s3892_s17 = scalar_lea.vmem (!%p4403_p10), [#allocation4], %s3228_s28 }
  0x7f   : > { %3579 = dma.done.wait (%p4404_p9), %s707_s3, 3072  }
  0x80   : > { %3581 = vsyncadd (%p4404_p9), %s707_s3, 4294964224  ;;  %s715_s15 = sand.u32 1, %s3745_s19   ;;  %s2894_s30 = sshll.u32 %s706_s21, 8 }
  0x81   : > { %s716_s18 = scalar_lea.sflag [#allocation7], %s715_s15  ;;  %s3899_s2 = scalar_lea.vmem [#allocation6], %s2894_s30 }
  0x82   : > { %3583 = dma.done.wait (%p4404_p9), %s716_s18, 8192  }
  0x83   : > { %3585 = vsyncadd (%p4404_p9), %s716_s18, 4294959104  ;;  %p821_p8 = scmp.lt.s32.totalorder %s3745_s19, 1  ;;  %s4405_s6 = sld [smem:[#allocation20_spill]] }
  0x84   : > { %s4406_s5 = sld [smem:[#allocation19_spill]]  ;;  %s4407_s15 = sld [smem:[#allocation23_spill]] }
  0x85   : > { %s3907_s16 = scalar_select %p821_p8, %s3745_s19, 1 }
  0x86   : > { %s3951_s1 = scalar_lea.vmem [#allocation8], %s2894_s30  ;;  %p2899_p0 = scmp.ne.s32.totalorder %s3745_s19, 0 }
  0x87   : > { %s3229_s26 = smul.u32 3, %s3907_s16  ;;  %s3030_s10 = sshll.u32 %s3907_s16, 6 }
  0x88   : > { %s838_s12 = scalar_lea.vmem %s4354_s9, %s3907_s16  ;;  %s2898_s25 = sshll.u32 %s3907_s16, 2 }
  0x89   : > { %s3914_s4 = scalar_lea.vmem %s4405_s6, %s3030_s10  ;;  %s3937_s6 = scalar_lea.vmem %s4356_s11, %s2898_s25 }
  0x8a   : > { %s3923_s21 = scalar_lea.vmem %s4406_s5, %s3229_s26  ;;  %s845_s20 = scalar_lea.vmem %s4358_s13, %s3907_s16 }
  0x8b   : > { %s848_s22 = scalar_lea.vmem %s4359_s14, %s3907_s16  ;;  %s851_s5 = scalar_lea.vmem %s4407_s15, %s3907_s16 }
  0x8c   : > { %856 = sbr.rel (%p2899_p0) target bundleno = 463 (0x1cf), region = 116  ;;  %s4408_s10 = sld [smem:[#allocation15_spill]] (!%p2899_p0) }
  0x8d   : > { %s4409_s27 = sld [smem:[#allocation16_spill]] (!%p2899_p0)  ;;  %s4410_s28 = sld [smem:[#allocation17_spill]] (!%p2899_p0) }
  0x92   : > { %v857_v1 = vld [vmem:[%s4408_s10] sm:$0xff] (!%p2899_p0)  ;;  %v858_v2 = vld [vmem:[%s4408_s10 + $0x8] sm:$0xff] (!%p2899_p0) }
  0x93   : > { %861 = vadd.xlane.f32.xlu0 %v857_v1  ;;  %v2900_v18 = vld [vmem:[%s4409_s27] ss:$0 sm:$0xff] }
  0x94   : > { %v2901_v20 = vld [vmem:[%s4410_s28] ss:$0 sm:$0xff] }
  0x97   : > { %863 = vadd.xlane.f32.xlu0 %v858_v2 }
 0x120   : > { %v862_v3 = vpop.xlane.xlu0 %861 }
 0x121   : > { %v866_v4 = vmul.f32 0.0078125, %v862_v3 }
 0x123   : > { %v868_v5 = vsub.f32 %v857_v1, %v866_v4 }
 0x124   : > { %v864_v6 = vpop.xlane.xlu0 %863 }
 0x125   : > { %v867_v7 = vmul.f32 0.0078125, %v864_v6  ;;  %v870_v8 = vmul.f32 %v868_v5, %v868_v5 }
 0x127   : > { %v869_v9 = vsub.f32 %v858_v2, %v867_v7  ;;  %872 = vadd.xlane.f32.xlu1 %v870_v8 }
 0x129   : > { %v871_v10 = vmul.f32 %v869_v9, %v869_v9 }
 0x12b   : > { %874 = vadd.xlane.f32.xlu1 %v871_v10 }
 0x1b4   : > { %v873_v11 = vpop.xlane.xlu1 %872 }
 0x1b5   : > { %v876_v12 = vmul.f32 0.0078125, %v873_v11 }
 0x1b7   : > { %v878_v13 = vadd.f32 1e-12, %v876_v12 }
 0x1b8   : > { %v875_v14 = vpop.xlane.xlu1 %874 }
 0x1b9   : > { %3292 = vrsqrt.f32 %v878_v13  ;;  %v877_v15 = vmul.f32 0.0078125, %v875_v14 }
 0x1bb   : > { %v879_v16 = vadd.f32 1e-12, %v877_v15 }
 0x1bd   : > { %3294 = vrsqrt.f32 %v879_v16 }
 0x1c3   : > { %v3293_v17 = vpop.eup %3292 }
 0x1c4   : > { %v882_v19 = vmul.f32 %v3293_v17, %v868_v5 }
 0x1c6   : > { %v890_v21 = vmul.f32 %v2900_v18, %v882_v19 }
 0x1c7   : > { %v3295_v22 = vpop.eup %3294 }
 0x1c8   : > { %v898_v23 = vadd.f32 %v2901_v20, %v890_v21  ;;  %v883_v24 = vmul.f32 %v3295_v22, %v869_v9 }
 0x1ca   : > { %900 = vst [vmem:[#allocation2] sm:$0xff] %v898_v23  ;;  %v891_v25 = vmul.f32 %v2900_v18, %v883_v24 }
 0x1cc   : > { %v899_v26 = vadd.f32 %v2901_v20, %v891_v25 }
 0x1ce   : > { %901 = vst [vmem:[#allocation2 + $0x8] sm:$0xff] %v899_v26 }
 0x1cf PF: > { %v3301_v27 = vld [vmem:[%s3892_s17 + $0x4] ss:$12 sps:$4 sm:$0xff]   ;;  %v3303_v28 = vld [vmem:[%s3892_s17] ss:$12 sps:$4 sm:$0xff]   ;;  %v3611_v29 = vmov 0   ;;  %v3612_v30 = vmov 0.0   ;;  %v939_v56 = vlaneseq  ;;  %s4412_s30 = scalar_lea.vmem %s4352_s7, %s3907_s16  ;;  %s4413_s27 = scalar_lea.vmem %s4353_s8, %s3907_s16 }
 0x1d0   : > { %1114 = vmatprep.mubr.bf16.mxu0 %v3611_v29  ;;  %3118 = vmatprep.subr.bf16.mxu1 %v3612_v30  ;;  %v3304_v31 = vld [vmem:[%s3892_s17 + $0x1c] ss:$12 sps:$4 sm:$0xff]   ;;  %v3306_v32 = vld [vmem:[%s3892_s17 + $0x18] ss:$12 sps:$4 sm:$0xff]   ;;  %v3307_v33 = vld [vmem:[%s3892_s17 + $0x34] ss:$12 sps:$4 sm:$0xff]  }
 0x1d1   : > { %1082 = vmatprep.subr.bf16.mxu0 %v3301_v27  ;;  %v3309_v34 = vld [vmem:[%s3892_s17 + $0x30] ss:$12 sps:$4 sm:$0xff]   ;;  %v3310_v35 = vld [vmem:[%s3892_s17 + $0x4c] ss:$12 sps:$4 sm:$0xff]   ;;  %v3312_v36 = vld [vmem:[%s3892_s17 + $0x48] ss:$12 sps:$4 sm:$0xff]  }
 0x1d2   : > { %1083 = vmatpush1.bf16.msra.mxu0 %v3303_v28  ;;  %v3313_v37 = vld [vmem:[%s3892_s17 + $0x64] ss:$12 sps:$4 sm:$0xff]   ;;  %v3325_v38 = vld [vmem:[%s3892_s17 + $0x8] ss:$12 sps:$4 sm:$0xff]   ;;  %v3326_v39 = vld [vmem:[%s3892_s17 + $0x20] ss:$12 sps:$4 sm:$0xff]  }
 0x1d3   : > { %1084 = vmatprep.subr.bf16.mxu0 %v3304_v31  ;;  %3119 = vmatpush3.bf16.msra.mxu1 %v3325_v38  ;;  %v3315_v40 = vld [vmem:[%s3892_s17 + $0x60] ss:$12 sps:$4 sm:$0xff]   ;;  %v3316_v41 = vld [vmem:[%s3892_s17 + $0x7c] ss:$12 sps:$4 sm:$0xff]   ;;  %v3327_v42 = vld [vmem:[%s3892_s17 + $0x38] ss:$12 sps:$4 sm:$0xff]  }
 0x1d4   : > { %3120 = vmatprep.subr.bf16.mxu1 %v3612_v30  ;;  %v3318_v43 = vld [vmem:[%s3892_s17 + $0x78] ss:$12 sps:$4 sm:$0xff]   ;;  %v3319_v44 = vld [vmem:[%s3892_s17 + $0x94] ss:$12 sps:$4 sm:$0xff]   ;;  %v3328_v45 = vld [vmem:[%s3892_s17 + $0x50] ss:$12 sps:$4 sm:$0xff]  }
 0x1d5   : > { %v3321_v46 = vld [vmem:[%s3892_s17 + $0x90] ss:$12 sps:$4 sm:$0xff]   ;;  %v3322_v47 = vld [vmem:[%s3892_s17 + $0xac] ss:$12 sps:$4 sm:$0xff]   ;;  %v3329_v48 = vld [vmem:[%s3892_s17 + $0x68] ss:$12 sps:$4 sm:$0xff]  }
 0x1d6   : > { %1085 = vmatpush1.bf16.msra.mxu0 %v3306_v32  ;;  %v3324_v49 = vld [vmem:[%s3892_s17 + $0xa8] ss:$12 sps:$4 sm:$0xff]   ;;  %v3330_v52 = vld [vmem:[%s3892_s17 + $0x80] ss:$12 sps:$4 sm:$0xff]   ;;  %v3331_v54 = vld [vmem:[%s3892_s17 + $0x98] ss:$12 sps:$4 sm:$0xff]  }
 0x1d7   : > { %1086 = vmatprep.subr.bf16.mxu0 %v3307_v33  ;;  %3121 = vmatpush3.bf16.msra.mxu1 %v3326_v39  ;;  %v3992_v50 = vld [vmem:[#allocation2] sm:$0xff]  ;;  %v3994_v51 = vld [vmem:[#allocation2 + $0x8] sm:$0xff]  ;;  %vm3613_vm0 = vmmov 0   ;;  %v4013_v57 = vshrl.u32 %v939_v56, 7  ;;  %vm1174_vm1 = vcmask 523264   ;;  %vm1311_vm2 = vcmask 1043456  }
 0x1d8   : > { %3122 = vmatprep.subr.bf16.mxu1 %v3612_v30  ;;  %v904_v53 = vpack.c.bf16 %v3994_v51, %v3992_v50  ;;  %v3332_v55 = vld [vmem:[%s3892_s17 + $0xb0] ss:$12 sps:$4 sm:$0xff]   ;;  %3134 = vmatprep.mubr.msk.bf16.mxu1 %vm3613_vm0, %v3612_v30  ;;  %s4411_s3 = sld [smem:[#allocation14_spill]]  ;;  %vm1283_vm3 = vcmask 64512   ;;  %s3614_s29 = smov 64  }
 0x1d9   : > { %v945_v58 = vsub.s32 1, %v4013_v57  ;;  %v937_v59 = vld [vmem:[%s3923_s21] sm:$0x7]  ;;  %v941_v61 = vsub.s32 0, %v4013_v57  ;;  %v949_v13 = vsub.s32 2, %v4013_v57  ;;  %p3014_p7 = scmp.ne.s32.totalorder %s3745_s19, 1 }
 0x1da   : > { %1087 = vmatpush1.bf16.msra.mxu0 %v3309_v34  ;;  %vm3616_vm4 = vmmov (!%p3014_p7), 0   ;;  %vm2570_vm5 = vcmask (!%p3014_p7), 1040384   ;;  %s4416_s28 = sld [smem:[#allocation25_spill]] (!%p3014_p7)  ;;  %s4417_s18 = sld [smem:[#allocation26_spill]] (!%p3014_p7)  ;;  %vm2693_vm6 = vcmask (!%p3014_p7), 1041408  }
 0x1db   : > { %1088 = vmatprep.subr.bf16.mxu0 %v3310_v35  ;;  %3123 = vmatpush3.bf16.msra.mxu1 %v3327_v42  ;;  %v946_v60 = vrot.slane %v937_v59, %v945_v58  ;;  %v942_v3 = vrot.slane %v937_v59, %v941_v61  ;;  %v950_v14 = vrot.slane %v937_v59, %v949_v13  ;;  %s4418_s16 = sld [smem:[#allocation27_spill]] (!%p3014_p7) }
 0x1dc   : > { %3124 = vmatprep.subr.bf16.mxu1 %v3612_v30 }
 0x1de   : > { %1089 = vmatpush1.bf16.msra.mxu0 %v3312_v36  ;;  %v4043_v24 = vld [vmem:[%s4411_s3] ss:$0 sm:$0xff]  ;;  %v4050_v34 = vld [vmem:[%s4411_s3 + $0x1] ss:$0 sm:$0xff] }
 0x1df   : > { %1090 = vmatprep.subr.bf16.mxu0 %v3313_v37  ;;  %3125 = vmatpush3.bf16.msra.mxu1 %v3328_v45 }
 0x1e0   : > { %3126 = vmatprep.subr.bf16.mxu1 %v3612_v30 }
 0x1e2   : > { %1091 = vmatpush1.bf16.msra.mxu0 %v3315_v40 }
 0x1e3   : > { %1092 = vmatprep.subr.bf16.mxu0 %v3316_v41  ;;  %3127 = vmatpush3.bf16.msra.mxu1 %v3329_v48 }
 0x1e4   : > { %3128 = vmatprep.subr.bf16.mxu1 %v3612_v30 }
 0x1e6   : > { %1093 = vmatpush1.bf16.msra.mxu0 %v3318_v43 }
 0x1e7   : > { %1094 = vmatprep.subr.bf16.mxu0 %v3319_v44  ;;  %3129 = vmatpush3.bf16.msra.mxu1 %v3330_v52 }
 0x1e8   : > { %3130 = vmatprep.subr.bf16.mxu1 %v3612_v30 }
 0x1ea   : > { %1095 = vmatpush1.bf16.msra.mxu0 %v3321_v46 }
 0x1eb   : > { %1096 = vmatprep.subr.bf16.mxu0 %v3322_v47  ;;  %3131 = vmatpush3.bf16.msra.mxu1 %v3331_v54 }
 0x1ec   : > { %3132 = vmatprep.subr.bf16.mxu1 %v3612_v30 }
 0x1ee   : > { %1097 = vmatpush1.bf16.msra.mxu0 %v3324_v49 }
 0x1ef   : > { %3162 = vmatprep.subr.bf16.mxu0 %v3612_v30  ;;  %3133 = vmatpush3.bf16.msra.mxu1 %v3332_v55 }
 0x1f0   : > { %3138 = vmatprep.subr.bf16.mxu1 %v3612_v30 }
 0x1f1   : > { %1115 = vmatmul.mubr.bf16.vlgmr.msra.gmra.mrb[0].mxu0 %v904_v53 }
 0x1f2   : > { %3164 = vmatprep.mubr.msk.bf16.mxu0 %vm3613_vm0, %v3612_v30  ;;  %3135 = vmatmul.mubr.bf16.vlgmr.msra.gmra.mrb[0].mxu1 %v904_v53 }
 0x1f3   : > { %3140 = vmatprep.mubr.msk.bf16.mxu1 %vm3613_vm0, %v3612_v30 }
 0x2c4   : > { %v1116_v62 = vpop.f32.mrb[0].mxu0 }
 0x2c5   : > { %v1118_v63 = vpop.f32.mrb[1].mxu0  ;;  %v1117_v7 = vadd.f32 %v1116_v62, %v942_v3  ;;  %v1159_v15 = vpop.f32.mrb[0].mxu1 }
 0x2c6   : > { %v1119_v0 = vadd.f32 %v1118_v63, %v946_v60  ;;  %v1120_v1 = vpop.f32.mrb[2].mxu0  ;;  %v1160_v16 = vadd.f32 %v1159_v15, %v950_v14  ;;  %v3136_v17 = vpop.f32.mrb[1].mxu1 }
 0x2c7   : > { %v1122_v2 = vpop.f32.mrb[3].mxu0  ;;  %v1168_v9 = vpack.c.bf16 %v1117_v7, %v1117_v7  ;;  %v1121_v11 = vadd.f32 %v1120_v1, %v942_v3  ;;  %v1162_v18 = vpop.f32.mrb[2].mxu1 }
 0x2c8   : > { %v1170_v4 = vpack.c.bf16 %v1119_v0, %v1119_v0  ;;  %v1123_v6 = vadd.f32 %v1122_v2, %v946_v60  ;;  %v4035_v19 = vpack.c.bf16 %v1160_v16, %v1160_v16  ;;  %v1163_v20 = vadd.f32 %v1162_v18, %v950_v14  ;;  %v3137_v21 = vpop.f32.mrb[3].mxu1 }
 0x2c9   : > { %v1169_v12 = vpack.c.bf16 %v1121_v11, %v1121_v11 }
 0x2ca   : > { %v1179_v5 = vsel %vm1174_vm1, %v1170_v4, 0  ;;  %v1171_v8 = vpack.c.bf16 %v1123_v6, %v1123_v6  ;;  %v1313_v22 = vsel %vm1311_vm2, %v4035_v19, 0  ;;  %v1173_v59 = vpack.c.bf16 %v1163_v20, %v1163_v20 }
 0x2cb   : > { %3139 = vmatpush3.bf16.xpose.msra.mxu1 %v1179_v5 }
 0x2cc   : > { %3144 = vmatprep.subr.bf16.mxu1 %v3612_v30  ;;  %v1225_v10 = vsel %vm1174_vm1, %v1171_v8, 0  ;;  %v1359_v63 = vsel %vm1311_vm2, %v1173_v59, 0 }
 0x2d2   : > { %3141 = vmatmul.mubr.msk.bf16.vlgmr.msra.gmra.mrb[4].mxu1 %vm1174_vm1, %v1168_v9 }
 0x2d3   : > { %3145 = vmatpush3.bf16.xpose.msra.mxu1 %v1225_v10  ;;  %3146 = vmatprep.mubr.msk.bf16.mxu1 %vm3613_vm0, %v3612_v30 }
 0x2d4   : > { %3150 = vmatprep.subr.bf16.mxu1 %v3612_v30 }
 0x2da   : > { %3147 = vmatmul.mubr.msk.bf16.vlgmr.msra.gmra.mrb[8].mxu1 %vm1174_vm1, %v1169_v12 }
 0x2db   : > { %3152 = vmatprep.mubr.msk.bf16.mxu1 %vm3613_vm0, %v3612_v30  ;;  %3151 = vmatpush3.bf16.msra.mxu1 %v1313_v22 }
 0x2dc   : > { %3156 = vmatprep.subr.bf16.mxu1 %v3612_v30 }
 0x3a5   : > { %v1215_v23 = vpop.f32.mrb[4].mxu1 }
 0x3a6   : > { %v1267_v25 = vmul.f32 0.125, %v1215_v23  ;;  %v3142_v26 = vpop.f32.mrb[5].mxu1 }
 0x3a7   : > { %v1218_v27 = vpop.f32.mrb[6].mxu1 }
 0x3a8   : > { %v3143_v28 = vpop.f32.mrb[7].mxu1  ;;  %v1281_v31 = vadd.f32 %v4043_v24, %v1267_v25 }
 0x3aa   : > { %v1284_v32 = vsel %vm1283_vm3, %v1281_v31, -inf }
 0x3ab   : > { %1285 = vmax.xlane.f32.xlu0 %v1284_v32 }
 0x3ad   : > { %v1261_v33 = vpop.f32.mrb[8].mxu1 }
 0x3ae   : > { %v1268_v35 = vmul.f32 0.125, %v1261_v33  ;;  %v3148_v36 = vpop.f32.mrb[9].mxu1 }
 0x3af   : > { %v1264_v37 = vpop.f32.mrb[10].mxu1 }
 0x3b0   : > { %v3149_v38 = vpop.f32.mrb[11].mxu1  ;;  %v1282_v39 = vadd.f32 %v4050_v34, %v1268_v35 }
 0x3b2   : > { %v1287_v40 = vsel %vm1283_vm3, %v1282_v39, -inf }
 0x3b3   : > { %1288 = vmax.xlane.f32.xlu0 %v1287_v40 }
 0x3c9   : > { %1405 = vrot.lane.b32.xlu0 %v1170_v4, %s3614_s29 }
 0x438   : > { %v1286_v41 = vpop.xlane.xlu0 %1285 }
 0x439   : > { %v1290_v42 = vsub.f32 %v1281_v31, %v1286_v41 }
 0x43b   : > { %v1292_v43 = vmul.f32 1.442695, %v1290_v42 }
 0x43d   : > { %3421 = vpow2.f32 %v1292_v43 }
 0x440   : > { %v1289_v44 = vpop.xlane.xlu0 %1288 }
 0x441   : > { %v1291_v49 = vsub.f32 %v1282_v39, %v1289_v44 }
 0x443   : > { %v1294_v52 = vmul.f32 1.442695, %v1291_v49 }
 0x444   : > { %v1406_v45 = vpop.permute.xlu0 %1405 }
 0x445   : > { %v1411_v46 = vsel %vm1174_vm1, %v1406_v45, 0  ;;  %3423 = vpow2.f32 %v1294_v52 }
 0x446   : > { %3163 = vmatpush3.bf16.xpose.msra.mxu0 %v1411_v46 }
 0x447   : > { %v3422_v47 = vpop.eup %3421  ;;  %3174 = vmatprep.subr.bf16.mxu0 %v3612_v30 }
 0x448   : > { %v1296_v48 = vsel %vm1283_vm3, %v3422_v47, 0.0 }
 0x449   : > { %1297 = vadd.xlane.f32.xlu1 %v1296_v48 }
 0x44f   : > { %v3424_v53 = vpop.eup %3423 }
 0x450   : > { %v1299_v54 = vsel %vm1283_vm3, %v3424_v53, 0.0 }
 0x45a   : > { %1457 = vrot.lane.b32.xlu1 %v1171_v8, %s3614_s29 }
 0x47e   : > { %1300 = vadd.xlane.f32.xlu1 %v1299_v54 }
 0x48f   : > { %1402 = vrot.lane.b32.xlu1 %v1168_v9, %s3614_s29 }
 0x493   : > { %1454 = vrot.lane.b32.xlu1 %v1169_v12, %s3614_s29 }
 0x4d6   : > { %v1298_v55 = vpop.xlane.xlu1 %1297 }
 0x4d7   : > { %3425 = vrcp.f32 %v1298_v55 }
 0x4da   : > { %v1458_v0 = vpop.permute.xlu1 %1457 }
 0x4db   : > { %v1463_v6 = vsel %vm1174_vm1, %v1458_v0, 0  ;;  %v3337_v0 = vld [vmem:[%s3914_s4 + $0x20] sm:$0xff]  }
 0x4e1   : > { %v3426_v56 = vpop.eup %3425 }
 0x4e2   : > { %v1303_v60 = vmul.f32 %v3426_v56, %v3422_v47 }
 0x4e4   : > { %v1306_v62 = vpack.c.bf16 %v1303_v60, %v1303_v60  ;;  %v3334_v60 = vld [vmem:[%s3914_s4 + $0x8] sm:$0xff]  }
 0x4e6   : > { %3153 = vmatmul.mubr.msk.bf16.vlgmr.msra.gmra.mrb[12].mxu1 %vm1283_vm3, %v1306_v62  ;;  %v3335_v62 = vld [vmem:[%s3914_s4 + $0x10] sm:$0xff]  }
 0x4e7   : > { %3157 = vmatpush3.bf16.msra.mxu1 %v1359_v63  ;;  %3158 = vmatprep.mubr.msk.bf16.mxu1 %vm3613_vm0, %v3612_v30  ;;  %v3336_v63 = vld [vmem:[%s3914_s4 + $0x18] sm:$0xff]  }
 0x4e8   : > { %3168 = vmatprep.subr.bf16.mxu1 %v3612_v30 }
 0x50b   : > { %v1301_v1 = vpop.xlane.xlu1 %1300 }
 0x50c   : > { %3427 = vrcp.f32 %v1301_v1  ;;  %v3338_v1 = vld [vmem:[%s3914_s4 + $0x28] sm:$0xff]  }
 0x50f   : > { %v1403_v2 = vpop.permute.xlu1 %1402 }
 0x510   : > { %3165 = vmatmul.mubr.msk.bf16.vlgmr.msra.gmra.mrb[4].mxu0 %vm1174_vm1, %v1403_v2  ;;  %v3339_v2 = vld [vmem:[%s3914_s4 + $0x30] sm:$0xff]  }
 0x511   : > { %3176 = vmatprep.mubr.msk.bf16.mxu0 %vm3613_vm0, %v3612_v30 }
 0x513   : > { %v1455_v7 = vpop.permute.xlu1 %1454 }
 0x516   : > { %v3428_v3 = vpop.eup %3427 }
 0x517   : > { %v1305_v4 = vmul.f32 %v3428_v3, %v3424_v53  ;;  %v3340_v3 = vld [vmem:[%s3914_s4 + $0x38] sm:$0xff]  }
 0x519   : > { %v1307_v5 = vpack.c.bf16 %v1305_v4, %v1305_v4 }
 0x51b   : > { %3159 = vmatmul.mubr.msk.bf16.vlgmr.msra.gmra.mrb[16].mxu1 %vm1283_vm3, %v1307_v5 }
 0x51c   : > { %3169 = vmatpush3.bf16.xpose.msra.mxu1 %v1463_v6  ;;  %3170 = vmatprep.mubr.msk.bf16.mxu1 %vm3613_vm0, %v3612_v30 }
 0x51d   : > { %3180 = vmatprep.subr.bf16.mxu1 %v3612_v30 }
 0x523   : > { %3171 = vmatmul.mubr.msk.bf16.vlgmr.msra.gmra.mrb[20].mxu1 %vm1174_vm1, %v1455_v7 }
 0x524   : > { %3182 = vmatprep.mubr.msk.bf16.mxu1 %vm3613_vm0, %v3612_v30 }
 0x5b9   : > { %v4078_v8 = vpop.f32.mrb[12].mxu1 }
 0x5ba   : > { %v3154_v9 = vpop.f32.mrb[13].mxu1 }
 0x5bb   : > { %v1352_v10 = vpop.f32.mrb[14].mxu1 }
 0x5bc   : > { %v3155_v11 = vpop.f32.mrb[15].mxu1 }
 0x5e3   : > { %v1447_v12 = vpop.f32.mrb[4].mxu0 }
 0x5e4   : > { %v1505_v14 = vmul.f32 0.125, %v1447_v12  ;;  %v3166_v15 = vpop.f32.mrb[5].mxu0 }
 0x5e5   : > { %v1450_v16 = vpop.f32.mrb[6].mxu0 }
 0x5e6   : > { %v3167_v17 = vpop.f32.mrb[7].mxu0  ;;  %v1507_v18 = vadd.f32 %v4043_v24, %v1505_v14 }
 0x5e8   : > { %v1509_v20 = vsel %vm1283_vm3, %v1507_v18, -inf }
 0x5e9   : > { %1510 = vmax.xlane.f32.xlu0 %v1509_v20 }
 0x5ee   : > { %v4082_v21 = vpop.f32.mrb[16].mxu1 }
 0x5ef   : > { %v3160_v22 = vpop.f32.mrb[17].mxu1 }
 0x5f0   : > { %v1398_v23 = vpop.f32.mrb[18].mxu1  ;;  %v2936_v22 = vld [vmem:[%s4412_s30] ss:$0 sm:$0xff] }
 0x5f1   : > { %v3161_v25 = vpop.f32.mrb[19].mxu1 }
 0x5f6   : > { %v1499_v26 = vpop.f32.mrb[20].mxu1 }
 0x5f7   : > { %v1506_v27 = vmul.f32 0.125, %v1499_v26  ;;  %v3172_v28 = vpop.f32.mrb[21].mxu1 }
 0x5f8   : > { %v1502_v31 = vpop.f32.mrb[22].mxu1 }
 0x5f9   : > { %v3173_v32 = vpop.f32.mrb[23].mxu1  ;;  %v1508_v33 = vadd.f32 %v4050_v34, %v1506_v27  ;;  %v3341_v31 = vld [vmem:[%s3899_s2] ss:$16 sps:$4 sm:$0xff]  }
 0x5fa   : > { %v3343_v32 = vld [vmem:[%s3899_s2 + $0x4] ss:$16 sps:$4 sm:$0xff]  }
 0x5fb   : > { %v1512_v35 = vsel %vm1283_vm3, %v1508_v33, -inf }
 0x5fc   : > { %1513 = vmax.xlane.f32.xlu1 %v1512_v35  ;;  %v3346_v35 = vld [vmem:[%s3899_s2 + $0xc] ss:$16 sps:$4 sm:$0xff]  }
 0x60d   : > { %1583 = vrot.lane.b32.xlu1 %v1173_v59, %s3614_s29  ;;  %v3333_v59 = vld [vmem:[%s3914_s4] sm:$0xff]  }
 0x676   : > { %v1511_v24 = vpop.xlane.xlu0 %1510 }
 0x677   : > { %v1515_v36 = vsub.f32 %v1507_v18, %v1511_v24  ;;  %v3349_v24 = vld [vmem:[%s3899_s2 + $0x24] ss:$16 sps:$4 sm:$0xff]  }
 0x679   : > { %v1517_v37 = vmul.f32 1.442695, %v1515_v36  ;;  %v3352_v36 = vld [vmem:[%s3899_s2 + $0x2c] ss:$16 sps:$4 sm:$0xff]  }
 0x67b   : > { %3429 = vpow2.f32 %v1517_v37  ;;  %v3347_v37 = vld [vmem:[%s3899_s2 + $0x20] ss:$16 sps:$4 sm:$0xff]  }
 0x685   : > { %v3430_v38 = vpop.eup %3429 }
 0x686   : > { %v1521_v39 = vsel %vm1283_vm3, %v3430_v38, 0.0 }
 0x687   : > { %1522 = vadd.xlane.f32.xlu0 %v1521_v39 }
 0x689   : > { %v1514_v40 = vpop.xlane.xlu1 %1513 }
 0x68a   : > { %v1516_v41 = vsub.f32 %v1508_v33, %v1514_v40  ;;  %v3344_v33 = vld [vmem:[%s3899_s2 + $0x8] ss:$16 sps:$4 sm:$0xff]  }
 0x68c   : > { %v1519_v42 = vmul.f32 1.442695, %v1516_v41 }
 0x68d   : > { %v1584_v43 = vpop.permute.xlu1 %1583 }
 0x68e   : > { %3431 = vpow2.f32 %v1519_v42  ;;  %v1589_v34 = vsel %vm1311_vm2, %v1584_v43, 0 }
 0x68f   : > { %3181 = vmatpush3.bf16.msra.mxu1 %v1589_v34 }
 0x690   : > { %2012 = vmatprep.subr.bf16.mxu1 %v3343_v32  ;;  %v3393_v32 = vld [vmem:[%s3951_s1 + $0x48] sm:$0xff]  }
 0x698   : > { %v3432_v44 = vpop.eup %3431 }
 0x699   : > { %v1524_v45 = vsel %vm1283_vm3, %v3432_v44, 0.0 }
 0x69a   : > { %1525 = vadd.xlane.f32.xlu0 %v1524_v45  ;;  %v3358_v45 = vld [vmem:[%s3899_s2 + $0x4c] ss:$16 sps:$4 sm:$0xff]  }
 0x6b0   : > { %1534 = vrot.lane.b32.xlu0 %v4035_v19, %s3614_s29 }
 0x714   : > { %v1523_v46 = vpop.xlane.xlu0 %1522 }
 0x715   : > { %3433 = vrcp.f32 %v1523_v46  ;;  %v3353_v46 = vld [vmem:[%s3899_s2 + $0x40] ss:$16 sps:$4 sm:$0xff]  }
 0x71f   : > { %v3434_v47 = vpop.eup %3433 }
 0x720   : > { %v1528_v49 = vmul.f32 %v3434_v47, %v3430_v38  ;;  %v3356_v47 = vld [vmem:[%s3899_s2 + $0x48] ss:$16 sps:$4 sm:$0xff]  }
 0x722   : > { %v1531_v54 = vpack.c.bf16 %v1528_v49, %v1528_v49  ;;  %v3364_v49 = vld [vmem:[%s3899_s2 + $0x6c] ss:$16 sps:$4 sm:$0xff]  }
 0x727   : > { %v1526_v48 = vpop.xlane.xlu0 %1525 }
 0x728   : > { %3435 = vrcp.f32 %v1526_v48  ;;  %v3361_v48 = vld [vmem:[%s3899_s2 + $0x64] ss:$16 sps:$4 sm:$0xff]  }
 0x72b   : > { %v1535_v52 = vpop.permute.xlu0 %1534 }
 0x72c   : > { %v1540_v53 = vsel %vm1311_vm2, %v1535_v52, 0  ;;  %v3359_v52 = vld [vmem:[%s3899_s2 + $0x60] ss:$16 sps:$4 sm:$0xff]  }
 0x72d   : > { %3175 = vmatpush3.bf16.msra.mxu0 %v1540_v53  ;;  %v3362_v53 = vld [vmem:[%s3899_s2 + $0x68] ss:$16 sps:$4 sm:$0xff]  }
 0x72e   : > { %3186 = vmatprep.subr.bf16.mxu0 %v3612_v30 }
 0x730   : > { %3177 = vmatmul.mubr.msk.bf16.vlgmr.msra.gmra.mrb[8].mxu0 %vm1283_vm3, %v1531_v54  ;;  %v3367_v54 = vld [vmem:[%s3899_s2 + $0x84] ss:$16 sps:$4 sm:$0xff]  }
 0x731   : > { %3202 = vmatprep.mubr.msk.bf16.mxu0 %vm3613_vm0, %v3612_v30  ;;  %3187 = vmatpush3.bf16.msra.mxu0 %v3333_v59  ;;  %v3373_v59 = vld [vmem:[%s3899_s2 + $0xa4] ss:$16 sps:$4 sm:$0xff]  }
 0x732   : > { %v3436_v19 = vpop.eup %3435  ;;  %3188 = vmatprep.subr.bf16.mxu0 %v3612_v30 }
 0x733   : > { %v1530_v55 = vmul.f32 %v3436_v19, %v3432_v44  ;;  %v3355_v44 = vld [vmem:[%s3899_s2 + $0x44] ss:$16 sps:$4 sm:$0xff]   ;;  %v3370_v19 = vld [vmem:[%s3899_s2 + $0x8c] ss:$16 sps:$4 sm:$0xff]  }
 0x735   : > { %v1532_v56 = vpack.c.bf16 %v1530_v55, %v1530_v55  ;;  %3189 = vmatpush3.bf16.msra.mxu0 %v3334_v60  ;;  %v3365_v55 = vld [vmem:[%s3899_s2 + $0x80] ss:$16 sps:$4 sm:$0xff]   ;;  %v3376_v60 = vld [vmem:[%s3899_s2 + $0xac] ss:$16 sps:$4 sm:$0xff]  }
 0x736   : > { %3190 = vmatprep.subr.bf16.mxu0 %v3612_v30 }
 0x737   : > { %3183 = vmatmul.mubr.msk.bf16.vlgmr.msra.gmra.mrb[24].mxu1 %vm1283_vm3, %v1532_v56  ;;  %v3368_v56 = vld [vmem:[%s3899_s2 + $0x88] ss:$16 sps:$4 sm:$0xff]  }
 0x738   : > { %2044 = vmatprep.mubr.bf16.mxu1 %v3611_v29  ;;  %2013 = vmatpush1.bf16.msra.mxu1 %v3341_v31  ;;  %v3392_v31 = vld [vmem:[%s3951_s1 + $0x80] sm:$0xff]  }
 0x739   : > { %3191 = vmatpush3.bf16.msra.mxu0 %v3335_v62  ;;  %2014 = vmatprep.subr.bf16.mxu1 %v3349_v24  ;;  %v3371_v62 = vld [vmem:[%s3899_s2 + $0xa0] ss:$16 sps:$4 sm:$0xff]   ;;  %v3396_v24 = vld [vmem:[%s3951_s1 + $0x88] sm:$0xff]  }
 0x73a   : > { %3192 = vmatprep.subr.bf16.mxu0 %v3612_v30 }
 0x73c   : > { %2015 = vmatpush1.bf16.msra.mxu1 %v3347_v37  ;;  %v3398_v37 = vld [vmem:[%s3951_s1 + $0xd0] sm:$0xff]  }
 0x73d   : > { %3193 = vmatpush3.bf16.msra.mxu0 %v3336_v63  ;;  %2016 = vmatprep.subr.bf16.mxu1 %v3355_v44  ;;  %v3374_v63 = vld [vmem:[%s3899_s2 + $0xa8] ss:$16 sps:$4 sm:$0xff]   ;;  %v3408_v44 = vld [vmem:[%s3951_s1 + $0xa0] sm:$0xff]  }
 0x73e   : > { %3194 = vmatprep.subr.bf16.mxu0 %v3612_v30 }
 0x740   : > { %2017 = vmatpush1.bf16.msra.mxu1 %v3353_v46  ;;  %v3410_v46 = vld [vmem:[%s3951_s1 + $0xe8] sm:$0xff]  }
 0x741   : > { %3195 = vmatpush3.bf16.msra.mxu0 %v3337_v0  ;;  %2018 = vmatprep.subr.bf16.mxu1 %v3361_v48  ;;  %v3379_v0 = vld [vmem:[%s3899_s2 + $0xc4] ss:$16 sps:$4 sm:$0xff]   ;;  %v3412_v48 = vld [vmem:[%s3951_s1 + $0xa8] sm:$0xff]  }
 0x742   : > { %3196 = vmatprep.subr.bf16.mxu0 %v3612_v30 }
 0x744   : > { %2019 = vmatpush1.bf16.msra.mxu1 %v3359_v52  ;;  %v3414_v52 = vld [vmem:[%s3951_s1 + $0xf0] sm:$0xff]  }
 0x745   : > { %3197 = vmatpush3.bf16.msra.mxu0 %v3338_v1  ;;  %2020 = vmatprep.subr.bf16.mxu1 %v3367_v54  ;;  %v3382_v1 = vld [vmem:[%s3899_s2 + $0xcc] ss:$16 sps:$4 sm:$0xff]   ;;  %v3416_v54 = vld [vmem:[%s3951_s1 + $0xb0] sm:$0xff]  }
 0x746   : > { %3198 = vmatprep.subr.bf16.mxu0 %v3612_v30 }
 0x748   : > { %2021 = vmatpush1.bf16.msra.mxu1 %v3365_v55  ;;  %v3418_v55 = vld [vmem:[%s3951_s1 + $0xf8] sm:$0xff]  }
 0x749   : > { %3199 = vmatpush3.bf16.msra.mxu0 %v3339_v2  ;;  %2022 = vmatprep.subr.bf16.mxu1 %v3373_v59  ;;  %v3377_v2 = vld [vmem:[%s3899_s2 + $0xc0] ss:$16 sps:$4 sm:$0xff]   ;;  %v3420_v59 = vld [vmem:[%s3951_s1 + $0xb8] sm:$0xff]  }
 0x74a   : > { %3200 = vmatprep.subr.bf16.mxu0 %v3612_v30 }
 0x74c   : > { %2023 = vmatpush1.bf16.msra.mxu1 %v3371_v62  ;;  %v1846_v62 = vsub.s32 3, %v4013_v57 }
 0x74d   : > { %3201 = vmatpush3.bf16.msra.mxu0 %v3340_v3  ;;  %v3380_v3 = vld [vmem:[%s3899_s2 + $0xc8] ss:$16 sps:$4 sm:$0xff]   ;;  %2024 = vmatprep.subr.bf16.mxu1 %v3379_v0 }
 0x74e   : > { %2055 = vmatprep.subr.bf16.mxu0 %v3346_v35  ;;  %v3395_v35 = vld [vmem:[%s3951_s1 + $0x8] sm:$0xff]  }
 0x750   : > { %2025 = vmatpush1.bf16.msra.mxu1 %v3377_v2 }
 0x803   : > { %v1576_v4 = vpop.f32.mrb[8].mxu0 }
 0x804   : > { %v3178_v5 = vpop.f32.mrb[9].mxu0 }
 0x805   : > { %v1579_v6 = vpop.f32.mrb[10].mxu0  ;;  %v3388_v5 = vld [vmem:[%s3899_s2 + $0xec] ss:$16 sps:$4 sm:$0xff]  }
 0x806   : > { %v3179_v7 = vpop.f32.mrb[11].mxu0  ;;  %v3383_v6 = vld [vmem:[%s3899_s2 + $0xe0] ss:$16 sps:$4 sm:$0xff]  }
 0x807   : > { %v3386_v7 = vld [vmem:[%s3899_s2 + $0xe8] ss:$16 sps:$4 sm:$0xff]  }
 0x80a   : > { %v1625_v9 = vpop.f32.mrb[24].mxu1 }
 0x80b   : > { %v3296_v10 = vpack.i.bf16 %v1625_v9, %v1576_v4  ;;  %v3184_v11 = vpop.f32.mrb[25].mxu1  ;;  %v3385_v4 = vld [vmem:[%s3899_s2 + $0xe4] ss:$16 sps:$4 sm:$0xff]  }
 0x80c   : > { %v1628_v12 = vpop.f32.mrb[26].mxu1  ;;  %2026 = vmatprep.subr.bf16.mxu1 %v3385_v4 }
 0x80d   : > { %3297 = vrot.lane.b32.xlu1 %v3296_v10, %s3614_s29  ;;  %v3185_v14 = vpop.f32.mrb[27].mxu1  ;;  %2027 = vmatpush1.bf16.msra.mxu1 %v3383_v6 }
 0x87f   : > { %v3298_v15 = vpop.permute.xlu1 %3297 }
 0x880   : > { %v3300_v16 = vunpack.i.h.bf16 %v3298_v15  ;;  %v3299_v17 = vunpack.i.l.bf16 %v3298_v15 }
 0x882   : > { %v1640_v30 = vsel %vm1174_vm1, %v4082_v21, %v3300_v16  ;;  %v1639_v18 = vsel %vm1174_vm1, %v4078_v8, %v3299_v17 }
 0x883   : > { %v1641_v20 = vpack.c.bf16 %v1640_v30, %v1639_v18  ;;  %v2945_v30 = vld [vmem:[%s4413_s27] ss:$0 sm:$0xff] }
 0x885   : > { %3203 = vmatmul.mubr.bf16.vlgmr.msra.gmra.mrb[12].mxu0 %v1641_v20 }
 0x886   : > { %2087 = vmatprep.mubr.bf16.mxu0 %v3611_v29  ;;  %2056 = vmatpush1.bf16.msra.mxu0 %v3344_v33  ;;  %v3394_v33 = vld [vmem:[%s3951_s1 + $0xc8] sm:$0xff]  }
 0x887   : > { %2057 = vmatprep.subr.bf16.mxu0 %v3352_v36  ;;  %v3397_v36 = vld [vmem:[%s3951_s1 + $0x50] sm:$0xff]  }
 0x958   : > { %v1747_v23 = vpop.f32.mrb[12].mxu0 }
 0x959   : > { %v1748_v21 = vadd.f32 %v2936_v22, %v1747_v23  ;;  %v3204_v25 = vpop.f32.mrb[13].mxu0  ;;  %v2946_v23 = vld [vmem:[%s838_s12] ss:$0 sm:$0xff] }
 0x95a   : > { %v1750_v26 = vpop.f32.mrb[14].mxu0 }
 0x95b   : > { %v1751_v8 = vadd.f32 %v2936_v22, %v1750_v26  ;;  %v3205_v27 = vpop.f32.mrb[15].mxu0  ;;  %v1754_v28 = vadd.f32 %v1748_v21, %v3992_v50  ;;  %v3350_v50 = vld [vmem:[%s3899_s2 + $0x28] ss:$16 sps:$4 sm:$0xff]  }
 0x95c   : > { %2058 = vmatpush1.bf16.msra.mxu0 %v3350_v50  ;;  %v3389_v27 = vld [vmem:[%s3951_s1 + $0x40] sm:$0xff]   ;;  %v3399_v50 = vld [vmem:[%s3951_s1 + $0x10] sm:$0xff]  }
 0x95d   : > { %1758 = vadd.xlane.f32.xlu1 %v1754_v28  ;;  %v1755_v29 = vadd.f32 %v1751_v8, %v3994_v51  ;;  %2059 = vmatprep.subr.bf16.mxu0 %v3358_v45  ;;  %v3409_v45 = vld [vmem:[%s3951_s1 + $0x68] sm:$0xff]  }
 0x95e   : > { %3065 = vmatprep.subr.bf16.mxu1 %v3389_v27 }
 0x95f   : > { %1760 = vadd.xlane.f32.xlu0 %v1755_v29 }
 0x960   : > { %2060 = vmatpush1.bf16.msra.mxu0 %v3356_v47  ;;  %v3411_v47 = vld [vmem:[%s3951_s1 + $0x28] sm:$0xff]  }
 0x961   : > { %2061 = vmatprep.subr.bf16.mxu0 %v3364_v49  ;;  %v3413_v49 = vld [vmem:[%s3951_s1 + $0x70] sm:$0xff]  }
 0x964   : > { %2062 = vmatpush1.bf16.msra.mxu0 %v3362_v53  ;;  %v3415_v53 = vld [vmem:[%s3951_s1 + $0x30] sm:$0xff]  }
 0x965   : > { %2063 = vmatprep.subr.bf16.mxu0 %v3370_v19  ;;  %v3417_v19 = vld [vmem:[%s3951_s1 + $0x78] sm:$0xff]  }
 0x968   : > { %2064 = vmatpush1.bf16.msra.mxu0 %v3368_v56  ;;  %v3419_v56 = vld [vmem:[%s3951_s1 + $0x38] sm:$0xff]  }
 0x969   : > { %2065 = vmatprep.subr.bf16.mxu0 %v3376_v60  ;;  %v1830_v60 = vld [vmem:[%s3937_s6] sm:$0xf] }
 0x96a   : > { %v1843_v0 = vrot.slane %v1830_v60, %v949_v13  ;;  %v1847_v2 = vrot.slane %v1830_v60, %v1846_v62 }
 0x96c   : > { %2066 = vmatpush1.bf16.msra.mxu0 %v3374_v63  ;;  %v1835_v63 = vrot.slane %v1830_v60, %v941_v61 }
 0x96d   : > { %2067 = vmatprep.subr.bf16.mxu0 %v3382_v1  ;;  %v1839_v1 = vrot.slane %v1830_v60, %v945_v58 }
 0x970   : > { %2068 = vmatpush1.bf16.msra.mxu0 %v3380_v3 }
 0x971   : > { %2069 = vmatprep.subr.bf16.mxu0 %v3388_v5 }
 0x974   : > { %2070 = vmatpush1.bf16.msra.mxu0 %v3386_v7 }
 0x9ea   : > { %v1759_v51 = vpop.xlane.xlu1 %1758 }
 0x9eb   : > { %v1763_v38 = vmul.f32 0.0078125, %v1759_v51  ;;  %v3400_v51 = vld [vmem:[%s3951_s1 + $0x90] sm:$0xff]  }
 0x9ec   : > { %v1761_v39 = vpop.xlane.xlu0 %1760 }
 0x9ed   : > { %v4135_v40 = vsub.f32 %v1754_v28, %v1763_v38  ;;  %v1764_v41 = vmul.f32 0.0078125, %v1761_v39  ;;  %v3390_v28 = vld [vmem:[%s3951_s1 + $0xc0] sm:$0xff]   ;;  %v3401_v38 = vld [vmem:[%s3951_s1 + $0x58] sm:$0xff]  }
 0x9ee   : > { %3087 = vmatprep.subr.bf16.mxu0 %v3390_v28  ;;  %v3402_v39 = vld [vmem:[%s3951_s1 + $0xd8] sm:$0xff]  }
 0x9ef   : > { %v4137_v42 = vsub.f32 %v1755_v29, %v1764_v41  ;;  %v1767_v43 = vmul.f32 %v4135_v40, %v4135_v40  ;;  %v3391_v29 = vld [vmem:[%s3951_s1] sm:$0xff]   ;;  %v3404_v41 = vld [vmem:[%s3951_s1 + $0x98] sm:$0xff]  }
 0x9f1   : > { %1769 = vadd.xlane.f32.xlu0 %v1767_v43  ;;  %v1768_v34 = vmul.f32 %v4137_v42, %v4137_v42  ;;  %v3406_v43 = vld [vmem:[%s3951_s1 + $0xe0] sm:$0xff]  }
 0x9f5   : > { %1771 = vadd.xlane.f32.xlu0 %v1768_v34  ;;  %v3407_v34 = vld [vmem:[%s3951_s1 + $0x20] sm:$0xff]  }
 0xa7e   : > { %v1770_v9 = vpop.xlane.xlu0 %1769 }
 0xa7f   : > { %v1773_v10 = vmul.f32 0.0078125, %v1770_v9 }
 0xa81   : > { %v1775_v11 = vadd.f32 1e-12, %v1773_v10 }
 0xa82   : > { %v1772_v12 = vpop.xlane.xlu0 %1771 }
 0xa83   : > { %3437 = vrsqrt.f32 %v1775_v11  ;;  %v1774_v14 = vmul.f32 0.0078125, %v1772_v12 }
 0xa85   : > { %v1776_v15 = vadd.f32 1e-12, %v1774_v14 }
 0xa87   : > { %3439 = vrsqrt.f32 %v1776_v15 }
 0xa8d   : > { %v3438_v16 = vpop.eup %3437 }
 0xa8e   : > { %v1779_v17 = vmul.f32 %v3438_v16, %v4135_v40  ;;  %v3403_v40 = vld [vmem:[%s3951_s1 + $0x18] sm:$0xff]  }
 0xa90   : > { %v1787_v22 = vmul.f32 %v2945_v30, %v1779_v17 }
 0xa91   : > { %v3440_v18 = vpop.eup %3439 }
 0xa92   : > { %v1780_v20 = vmul.f32 %v3440_v18, %v4137_v42  ;;  %v4179_v25 = vadd.f32 %v2946_v23, %v1787_v22  ;;  %v3405_v42 = vld [vmem:[%s3951_s1 + $0x60] sm:$0xff]  }
 0xa94   : > { %v1788_v21 = vmul.f32 %v2945_v30, %v1780_v20 }
 0xa96   : > { %v4181_v26 = vadd.f32 %v2946_v23, %v1788_v21 }
 0xa98   : > { %v1797_v8 = vpack.c.bf16 %v4181_v26, %v4179_v25 }
 0xa9a   : > { %2045 = vmatmul.mubr.bf16.vlgmr.msra.gmra.mrb[28].mxu1 %v1797_v8  ;;  %2088 = vmatmul.mubr.bf16.vlgmr.msra.gmra.mrb[16].mxu0 %v1797_v8 }
 0xa9b   : > { %3066 = vmatpush3.bf16.msra.mxu1 %v3391_v29  ;;  %3088 = vmatpush3.bf16.msra.mxu0 %v3392_v31 }
 0xa9c   : > { %3067 = vmatprep.subr.bf16.mxu1 %v3393_v32  ;;  %3089 = vmatprep.subr.bf16.mxu0 %v3394_v33 }
 0xa9f   : > { %3068 = vmatpush3.bf16.msra.mxu1 %v3395_v35  ;;  %3090 = vmatpush3.bf16.msra.mxu0 %v3396_v24 }
 0xaa0   : > { %3069 = vmatprep.subr.bf16.mxu1 %v3397_v36  ;;  %3091 = vmatprep.subr.bf16.mxu0 %v3398_v37 }
 0xaa3   : > { %3070 = vmatpush3.bf16.msra.mxu1 %v3399_v50  ;;  %3092 = vmatpush3.bf16.msra.mxu0 %v3400_v51 }
 0xaa4   : > { %3071 = vmatprep.subr.bf16.mxu1 %v3401_v38  ;;  %3093 = vmatprep.subr.bf16.mxu0 %v3402_v39 }
 0xaa7   : > { %3072 = vmatpush3.bf16.msra.mxu1 %v3403_v40  ;;  %3094 = vmatpush3.bf16.msra.mxu0 %v3404_v41 }
 0xaa8   : > { %3073 = vmatprep.subr.bf16.mxu1 %v3405_v42  ;;  %3095 = vmatprep.subr.bf16.mxu0 %v3406_v43 }
 0xaab   : > { %3074 = vmatpush3.bf16.msra.mxu1 %v3407_v34  ;;  %3096 = vmatpush3.bf16.msra.mxu0 %v3408_v44 }
 0xaac   : > { %3075 = vmatprep.subr.bf16.mxu1 %v3409_v45  ;;  %3097 = vmatprep.subr.bf16.mxu0 %v3410_v46 }
 0xaaf   : > { %3076 = vmatpush3.bf16.msra.mxu1 %v3411_v47  ;;  %3098 = vmatpush3.bf16.msra.mxu0 %v3412_v48 }
 0xab0   : > { %3077 = vmatprep.subr.bf16.mxu1 %v3413_v49  ;;  %3099 = vmatprep.subr.bf16.mxu0 %v3414_v52 }
 0xab3   : > { %3078 = vmatpush3.bf16.msra.mxu1 %v3415_v53  ;;  %3100 = vmatpush3.bf16.msra.mxu0 %v3416_v54 }
 0xab4   : > { %3079 = vmatprep.subr.bf16.mxu1 %v3417_v19  ;;  %3101 = vmatprep.subr.bf16.mxu0 %v3418_v55 }
 0xab7   : > { %3080 = vmatpush3.bf16.msra.mxu1 %v3419_v56  ;;  %3102 = vmatpush3.bf16.msra.mxu0 %v3420_v59 }
 0xb6d   : > { %v2046_v3 = vpop.f32.mrb[28].mxu1  ;;  %v2089_v4 = vpop.f32.mrb[16].mxu0 }
 0xb6e   : > { %v4225_v5 = vadd.f32 %v2046_v3, %v1835_v63  ;;  %v4227_v6 = vadd.f32 %v2089_v4, %v1843_v0  ;;  %v2048_v7 = vpop.f32.mrb[29].mxu1  ;;  %v2091_v9 = vpop.f32.mrb[17].mxu0 }
 0xb6f   : > { %v4229_v10 = vadd.f32 %v2048_v7, %v1839_v1  ;;  %v4231_v11 = vadd.f32 %v2091_v9, %v1847_v2  ;;  %v2050_v61 = vpop.f32.mrb[30].mxu1  ;;  %v2093_v12 = vpop.f32.mrb[18].mxu0 }
 0xb70   : > { %v2098_v13 = vmul.f32 %v4225_v5, %v4225_v5  ;;  %v2100_v57 = vmul.f32 %v4227_v6, %v4227_v6  ;;  %v4237_v58 = vadd.f32 %v2050_v61, %v1835_v63  ;;  %v4239_v14 = vadd.f32 %v2093_v12, %v1843_v0  ;;  %v2052_v15 = vpop.f32.mrb[31].mxu1  ;;  %v2095_v16 = vpop.f32.mrb[19].mxu0 }
 0xb71   : > { %v2099_v17 = vmul.f32 %v4229_v10, %v4229_v10  ;;  %v2101_v30 = vmul.f32 %v4231_v11, %v4231_v11  ;;  %v4245_v18 = vadd.f32 %v2052_v15, %v1839_v1  ;;  %v4247_v20 = vadd.f32 %v2095_v16, %v1847_v2 }
 0xb72   : > { %v2106_v22 = vmul.f32 %v2098_v13, %v4225_v5  ;;  %v2108_v23 = vmul.f32 %v2100_v57, %v4227_v6  ;;  %v2102_v21 = vmul.f32 %v4237_v58, %v4237_v58  ;;  %v2104_v8 = vmul.f32 %v4239_v14, %v4239_v14 }
 0xb73   : > { %v2107_v27 = vmul.f32 %v2099_v17, %v4229_v10  ;;  %v2109_v28 = vmul.f32 %v2101_v30, %v4231_v11  ;;  %v2103_v29 = vmul.f32 %v4245_v18, %v4245_v18  ;;  %v2105_v31 = vmul.f32 %v4247_v20, %v4247_v20 }
 0xb74   : > { %v2114_v32 = vmul.f32 0.044715, %v2106_v22  ;;  %v2116_v33 = vmul.f32 0.044715, %v2108_v23  ;;  %v2110_v35 = vmul.f32 %v2102_v21, %v4237_v58  ;;  %v2112_v24 = vmul.f32 %v2104_v8, %v4239_v14 }
 0xb75   : > { %v2115_v36 = vmul.f32 0.044715, %v2107_v27  ;;  %v2117_v37 = vmul.f32 0.044715, %v2109_v28  ;;  %v2111_v50 = vmul.f32 %v2103_v29, %v4245_v18  ;;  %v2113_v51 = vmul.f32 %v2105_v31, %v4247_v20 }
 0xb76   : > { %v2122_v38 = vadd.f32 %v2114_v32, %v4225_v5  ;;  %v2124_v39 = vadd.f32 %v2116_v33, %v4227_v6  ;;  %v2118_v40 = vmul.f32 0.044715, %v2110_v35  ;;  %v2120_v41 = vmul.f32 0.044715, %v2112_v24 }
 0xb77   : > { %v2123_v42 = vadd.f32 %v2115_v36, %v4229_v10  ;;  %v2125_v43 = vadd.f32 %v2117_v37, %v4231_v11  ;;  %v2119_v34 = vmul.f32 0.044715, %v2111_v50  ;;  %v2121_v44 = vmul.f32 0.044715, %v2113_v51 }
 0xb78   : > { %v2130_v45 = vmul.f32 0.7978846, %v2122_v38  ;;  %v2132_v46 = vmul.f32 0.7978846, %v2124_v39  ;;  %v2126_v47 = vadd.f32 %v2118_v40, %v4237_v58  ;;  %v2128_v48 = vadd.f32 %v2120_v41, %v4239_v14 }
 0xb79   : > { %v2131_v49 = vmul.f32 0.7978846, %v2123_v42  ;;  %v2133_v52 = vmul.f32 0.7978846, %v2125_v43  ;;  %v2127_v53 = vadd.f32 %v2119_v34, %v4245_v18  ;;  %v2129_v54 = vadd.f32 %v2121_v44, %v4247_v20 }
 0xb7a   : > { %3441 = vtanh.f32 %v2130_v45  ;;  %v2134_v19 = vmul.f32 0.7978846, %v2126_v47  ;;  %v2136_v55 = vmul.f32 0.7978846, %v2128_v48 }
 0xb7b   : > { %3443 = vtanh.f32 %v2132_v46  ;;  %v2135_v56 = vmul.f32 0.7978846, %v2127_v53  ;;  %v2137_v59 = vmul.f32 0.7978846, %v2129_v54 }
 0xb7c   : > { %3445 = vtanh.f32 %v2131_v49 }
 0xb7d   : > { %3447 = vtanh.f32 %v2133_v52 }
 0xb7e   : > { %3449 = vtanh.f32 %v2134_v19 }
 0xb7f   : > { %3451 = vtanh.f32 %v2136_v55 }
 0xb80   : > { %3453 = vtanh.f32 %v2135_v56 }
 0xb81   : > { %3455 = vtanh.f32 %v2137_v59 }
 0xb84   : > { %v3442_v60 = vpop.eup %3441 }
 0xb85   : > { %v3444_v62 = vpop.eup %3443  ;;  %v2146_v63 = vadd.f32 1.0, %v3442_v60 }
 0xb86   : > { %v3446_v0 = vpop.eup %3445  ;;  %v2148_v1 = vadd.f32 1.0, %v3444_v62 }
 0xb87   : > { %v3448_v2 = vpop.eup %3447  ;;  %v2147_v3 = vadd.f32 1.0, %v3446_v0  ;;  %v2154_v61 = vmul.f32 0.5, %v2146_v63 }
 0xb88   : > { %v3450_v4 = vpop.eup %3449  ;;  %v2149_v7 = vadd.f32 1.0, %v3448_v2  ;;  %v2156_v57 = vmul.f32 0.5, %v2148_v1 }
 0xb89   : > { %v3452_v9 = vpop.eup %3451  ;;  %v2150_v12 = vadd.f32 1.0, %v3450_v4  ;;  %v2155_v22 = vmul.f32 0.5, %v2147_v3  ;;  %v2162_v27 = vmul.f32 %v2154_v61, %v4225_v5  ;;  %v3012_v3 = vld [vmem:[%s848_s22] ss:$0 sm:$0xff]  ;;  %s4415_s22 = sld [smem:[#allocation24_spill]] (!%p3014_p7) }
 0xb8a   : > { %v3454_v13 = vpop.eup %3453  ;;  %v2152_v15 = vadd.f32 1.0, %v3452_v9  ;;  %v2157_v8 = vmul.f32 0.5, %v2149_v7  ;;  %v2164_v31 = vmul.f32 %v2156_v57, %v4227_v6  ;;  %v3013_v9 = vld [vmem:[%s851_s5] ss:$0 sm:$0xff] }
 0xb8b   : > { %v3456_v16 = vpop.eup %3455  ;;  %v2158_v17 = vmul.f32 0.5, %v2150_v12  ;;  %v2151_v30 = vadd.f32 1.0, %v3454_v13  ;;  %v2163_v35 = vmul.f32 %v2155_v22, %v4229_v10  ;;  %v2979_v10 = vld [vmem:[%s845_s20] ss:$0 sm:$0xff] }
 0xb8c   : > { %v2160_v23 = vmul.f32 0.5, %v2152_v15  ;;  %v2153_v21 = vadd.f32 1.0, %v3456_v16  ;;  %v2165_v37 = vmul.f32 %v2157_v8, %v4231_v11 }
 0xb8d   : > { %v2166_v28 = vmul.f32 %v2158_v17, %v4237_v58  ;;  %v2159_v29 = vmul.f32 0.5, %v2151_v30  ;;  %v3615_v17 = vmov (!%p3014_p7), 0.0  }
 0xb8e   : > { %v2168_v32 = vmul.f32 %v2160_v23, %v4239_v14  ;;  %v2161_v33 = vmul.f32 0.5, %v2153_v21  ;;  %3206 = vmatprep.subr.bf16.mxu0 (!%p3014_p7), %v3615_v17 }
 0xb8f   : > { %v2167_v24 = vmul.f32 %v2159_v29, %v4245_v18  ;;  %v2170_v36 = vpack.c.bf16 %v2166_v28, %v2162_v27  ;;  %v3462_v16 = vld [vmem:[%s4415_s22] sm:$0xff] (!%p3014_p7)   ;;  %v3463_v30 = vld [vmem:[%s4415_s22 + $0x8] sm:$0xff] (!%p3014_p7)   ;;  %v3464_v22 = vld [vmem:[%s4415_s22 + $0x10] sm:$0xff] (!%p3014_p7)  }
 0xb90   : > { %v2169_v50 = vmul.f32 %v2161_v33, %v4247_v20  ;;  %v2172_v51 = vpack.c.bf16 %v2168_v32, %v2164_v31  ;;  %v3465_v23 = vld [vmem:[%s4415_s22 + $0x18] sm:$0xff] (!%p3014_p7)   ;;  %v3466_v21 = vld [vmem:[%s4415_s22 + $0x20] sm:$0xff] (!%p3014_p7)   ;;  %v3467_v8 = vld [vmem:[%s4415_s22 + $0x28] sm:$0xff] (!%p3014_p7)  }
 0xb91   : > { %v2171_v5 = vpack.c.bf16 %v2167_v24, %v2163_v35  ;;  %v3468_v27 = vld [vmem:[%s4415_s22 + $0x30] sm:$0xff] (!%p3014_p7)   ;;  %v3469_v29 = vld [vmem:[%s4415_s22 + $0x38] sm:$0xff] (!%p3014_p7)   ;;  %v3015_v33 = vld [vmem:[%s4416_s28] ss:$0 sm:$0xff] (!%p3014_p7) }
 0xb92   : > { %v2173_v38 = vpack.c.bf16 %v2169_v50, %v2165_v37 }
 0xb93   : > { %2469 = vmatprep.mubr.bf16.mxu1 %v2171_v5 }
 0xb94   : > { %2510 = vmatprep.mubr.bf16.mxu0 %v2173_v38  ;;  %2470 = vmatmul.mubr.bf16.vlgmr.msra.gmra.mrb[32].mxu1 %v2170_v36 }
 0xb95   : > { %2511 = vmatmul.mubr.bf16.vlgmr.msra.gmra.mrb[20].mxu0 %v2172_v51  ;;  %v3024_v51 = vld [vmem:[%s4417_s18] ss:$0 sm:$0xff] (!%p3014_p7) }
 0xb96   : > { %3207 = vmatpush3.bf16.msra.mxu0 (!%p3014_p7), %v3462_v16  ;;  %3222 = vmatprep.mubr.msk.bf16.mxu0 (!%p3014_p7), %vm3616_vm4, %v3615_v17 }
 0xb97   : > { %3208 = vmatprep.subr.bf16.mxu0 (!%p3014_p7), %v3615_v17 }
 0xb9a   : > { %3209 = vmatpush3.bf16.msra.mxu0 (!%p3014_p7), %v3463_v30 }
 0xb9b   : > { %3210 = vmatprep.subr.bf16.mxu0 (!%p3014_p7), %v3615_v17 }
 0xb9e   : > { %3211 = vmatpush3.bf16.msra.mxu0 (!%p3014_p7), %v3464_v22 }
 0xb9f   : > { %3212 = vmatprep.subr.bf16.mxu0 (!%p3014_p7), %v3615_v17 }
 0xba2   : > { %3213 = vmatpush3.bf16.msra.mxu0 (!%p3014_p7), %v3465_v23 }
 0xba3   : > { %3214 = vmatprep.subr.bf16.mxu0 (!%p3014_p7), %v3615_v17 }
 0xba6   : > { %3215 = vmatpush3.bf16.msra.mxu0 (!%p3014_p7), %v3466_v21 }
 0xba7   : > { %3216 = vmatprep.subr.bf16.mxu0 (!%p3014_p7), %v3615_v17 }
 0xbaa   : > { %3217 = vmatpush3.bf16.msra.mxu0 (!%p3014_p7), %v3467_v8 }
 0xbab   : > { %3218 = vmatprep.subr.bf16.mxu0 (!%p3014_p7), %v3615_v17 }
 0xbae   : > { %3219 = vmatpush3.bf16.msra.mxu0 (!%p3014_p7), %v3468_v27 }
 0xbaf   : > { %3220 = vmatprep.subr.bf16.mxu0 (!%p3014_p7), %v3615_v17 }
 0xbb2   : > { %3221 = vmatpush3.bf16.msra.mxu0 (!%p3014_p7), %v3469_v29 }
 0xc67   : > { %v3081_v6 = vpop.f32.mrb[32].mxu1 }
 0xc68   : > { %v3103_v58 = vpop.f32.mrb[20].mxu0  ;;  %v3082_v14 = vpop.f32.mrb[33].mxu1 }
 0xc69   : > { %v3083_v18 = vadd.f32 %v3082_v14, %v3081_v6  ;;  %v3104_v39 = vpop.f32.mrb[21].mxu0  ;;  %v3084_v11 = vpop.f32.mrb[34].mxu1 }
 0xc6a   : > { %v3105_v40 = vadd.f32 %v3104_v39, %v3103_v58  ;;  %v3106_v20 = vpop.f32.mrb[22].mxu0  ;;  %v3085_v41 = vpop.f32.mrb[35].mxu1  ;;  %v3617_v58 = vmov (!%p3014_p7), 0  }
 0xc6b   : > { %v2472_v42 = vadd.f32 %v3083_v18, %v2979_v10  ;;  %v3086_v43 = vadd.f32 %v3085_v41, %v3084_v11  ;;  %v3107_v34 = vpop.f32.mrb[23].mxu0  ;;  %3461 = vset.pattern.permute.xlu0 (!%p3014_p7), %v3617_v58 }
 0xc6c   : > { %v3108_v44 = vadd.f32 %v3107_v34, %v3106_v20 }
 0xc6d   : > { %v2513_v45 = vadd.f32 %v3105_v40, %v2472_v42  ;;  %v2475_v46 = vadd.f32 %v3086_v43, %v2979_v10  ;;  %v3025_v10 = vld [vmem:[#allocation3] ss:$0 sm:$0xff] (!%p3014_p7) }
 0xc6f   : > { %v2516_v47 = vadd.f32 %v3108_v44, %v2475_v46  ;;  %v2519_v48 = vadd.f32 %v2513_v45, %v4179_v25 }
 0xc71   : > { %2523 = vadd.xlane.f32.xlu1 %v2519_v48  ;;  %v2520_v49 = vadd.f32 %v2516_v47, %v4181_v26 }
 0xc73   : > { %2525 = vadd.xlane.f32.xlu0 %v2520_v49 }
 0xcfe   : > { %v2524_v52 = vpop.xlane.xlu1 %2523 }
 0xcff   : > { %v2527_v53 = vmul.f32 0.0078125, %v2524_v52 }
 0xd00   : > { %v2526_v54 = vpop.xlane.xlu0 %2525 }
 0xd01   : > { %v2529_v19 = vsub.f32 %v2519_v48, %v2527_v53  ;;  %v2528_v55 = vmul.f32 0.0078125, %v2526_v54 }
 0xd03   : > { %v2530_v56 = vsub.f32 %v2520_v49, %v2528_v55  ;;  %v2531_v59 = vmul.f32 %v2529_v19, %v2529_v19 }
 0xd05   : > { %2533 = vadd.xlane.f32.xlu1 %v2531_v59  ;;  %v2532_v60 = vmul.f32 %v2530_v56, %v2530_v56 }
 0xd07   : > { %2535 = vadd.xlane.f32.xlu0 %v2532_v60 }
 0xd92   : > { %v2534_v62 = vpop.xlane.xlu1 %2533 }
 0xd93   : > { %v2537_v63 = vmul.f32 0.0078125, %v2534_v62 }
 0xd94   : > { %v2536_v0 = vpop.xlane.xlu0 %2535 }
 0xd95   : > { %v2539_v25 = vadd.f32 1e-12, %v2537_v63  ;;  %v2538_v1 = vmul.f32 0.0078125, %v2536_v0 }
 0xd97   : > { %3457 = vrsqrt.f32 %v2539_v25  ;;  %v2540_v26 = vadd.f32 1e-12, %v2538_v1 }
 0xd99   : > { %3459 = vrsqrt.f32 %v2540_v26 }
 0xda1   : > { %v3458_v2 = vpop.eup %3457 }
 0xda2   : > { %v2543_v4 = vmul.f32 %v3458_v2, %v2529_v19 }
 0xda3   : > { %v3460_v7 = vpop.eup %3459 }
 0xda4   : > { %v2551_v61 = vmul.f32 %v3012_v3, %v2543_v4  ;;  %v2544_v12 = vmul.f32 %v3460_v7, %v2530_v56  ;;  %2566 = sbr.rel (%p3014_p7) target bundleno = 4004 (0xfa4), region = 120 }
 0xda6   : > { %v2559_v13 = vadd.f32 %v3013_v9, %v2551_v61  ;;  %v2552_v57 = vmul.f32 %v3012_v3, %v2544_v12 }
 0xda8   : > { %2561 = vst [vmem:[#allocation2] sm:$0xff] %v2559_v13  ;;  %v2560_v15 = vadd.f32 %v3013_v9, %v2552_v57 }
 0xdaa   : > { %2562 = vst [vmem:[#allocation2 + $0x8] sm:$0xff] %v2560_v15  ;;  %v2568_v28 = vrot.slane (!%p3014_p7), %v2560_v15, 7 }
 0xdac   : > { %v2571_v31 = vsel %vm2570_vm5, %v2559_v13, %v2568_v28 }
 0xdad   : > { %v2572_v32 = vpack.c.bf16 %v2571_v31, %v2571_v31 }
 0xdaf   : > { %3223 = vmatmul.mubr.bf16.vlgmr.msra.gmra.mrb[0].mxu0 %v2572_v32 }
 0xe82   : > { %v2678_v35 = vpop.f32.mrb[0].mxu0 }
 0xe83   : > { %v2679_v24 = vadd.f32 %v3015_v33, %v2678_v35  ;;  %v3224_v36 = vpop.f32.mrb[1].mxu0 }
 0xe84   : > { %v2681_v37 = vpop.f32.mrb[2].mxu0 }
 0xe85   : > { %3470 = vtanh.f32 %v2679_v24  ;;  %v3225_v50 = vpop.f32.mrb[3].mxu0 }
 0xe8f   : > { %v3471_v5 = vpop.eup %3470 }
 0xe90   : > { %v2692_v38 = vmul.f32 %v3471_v5, %v3024_v51 }
 0xe92   : > { %v2694_v6 = vsel %vm2693_vm6, %v2692_v38, 0.0 }
 0xe93   : > { %2695 = vadd.xlane.f32.xlu0 %v2694_v6 }
 0xf20   : > { %v2696_v14 = vpop.xlane.xlu0 %2695 }
 0xf21   : > { %v2704_v18 = vadd.f32 %v3025_v10, %v2696_v14 }
 0xf23   : > { %2707 = vperm.xlu0 %3461, %v2704_v18  }
 0xfa2   : > { %v2708_v39 = vpop.permute.xlu0 %2707 }
 0xfa3   : > { %2710 = vst [vmem:[%s4418_s16] sm:$0x3] %v2708_v39 }
 0xfa4 PF: > { %s4419_s25 = sld [smem:[#allocation12_spill]]  ;;  %s4420_s5 = sld [smem:[#allocation11_spill]] }
 0xfa5   : > { %s4421_s2 = sld [smem:[#allocation13_spill]]  ;;  %s4422_s23 = smov %s3592_s24 }
 0xfaa   : > { %p35_p12 = scmp.ge.s32.totalorder %s4419_s25, 4   ;;  %s4423_s24 = smov %s4420_s5 }
 0xfac   :  { %37 = sbr.rel (!%p35_p12) target bundleno = 20 (0x14), region = 195 }
 0xfb3   :  { %2722 = vsyncpa [#allocation5], 1 }
 0xfb4   :  { %2724 = vsyncpa [#allocation5 + $0x1], 1 }
 0xfb5   :  { %2725 = vsyncpa [#allocation7], 1 }
 0xfb6   :  { %2727 = vsyncpa [#allocation7 + $0x1], 1 }

</bundles_post_ra>
